<compile_context>
chip_gen: v7x
topology: tpu7x:2x2x1
jax: 0.10.0
libtpu: 0.0.40
codegen_flags: <defaults>
</compile_context>

<pallas_src>
import math

import numpy as np
import jax
import jax.numpy as jnp
from jax.experimental import pallas as pl
from jax.experimental.pallas import tpu as pltpu  # noqa: F401  (kept for TPU-specific tuning hooks)

# ---------------- config (small synthetic BERT) ----------------
B = 2           # batch
S = 8           # sequence length
H = 32          # hidden size
NH = 2          # attention heads
HD = H // NH    # head dim
FF = 64         # FFN intermediate size
VOCAB = 30      # vocab size
NUM_ENC = 2     # global + local encoder
BS = B * S
OUT_LANES = 128            # lane-dense padded output width (>= NUM_ENC * H)

# ---------------- packed parameter slab layout ----------------
# Each per-encoder parameter lives at a static, 8-row-aligned offset inside a
# single (SLAB_ROWS, 128) f32 slab.
PARAM_SPECS = (
    ("word_emb", (VOCAB, H)),
    ("pos_emb",  (BS, H)),          # positional embeddings pre-tiled over batch
    ("ln0_g", (1, H)), ("ln0_b", (1, H)),
    ("wq", (H, H)), ("bq", (1, H)),
    ("wk", (H, H)), ("bk", (1, H)),
    ("wv", (H, H)), ("bv", (1, H)),
    ("wo", (H, H)), ("bo", (1, H)),
    ("ln1_g", (1, H)), ("ln1_b", (1, H)),
    ("w1", (H, FF)), ("b1", (1, FF)),
    ("w2", (FF, H)), ("b2", (1, H)),
    ("ln2_g", (1, H)), ("ln2_b", (1, H)),
    ("wp", (H, H)), ("bp", (1, H)),
)
_SPEC_DICT = dict(PARAM_SPECS)


def _round_up(x, m):
    return (x + m - 1) // m * m


PARAM_OFFSETS = {}
_off = 0
for _name, (_r, _c) in PARAM_SPECS:
    PARAM_OFFSETS[_name] = _off
    _off = _round_up(_off + _r, 8)       # keep every param sublane-aligned
SLAB_ROWS = _round_up(_off, 8)
SLAB_COLS = 128


def pack_param_slab(params):
    """Pack a dict of per-encoder parameters into one (SLAB_ROWS, 128) f32 slab."""
    slab = np.zeros((SLAB_ROWS, SLAB_COLS), np.float32)
    for name, (r, c) in PARAM_SPECS:
        off = PARAM_OFFSETS[name]
        slab[off:off + r, :c] = np.asarray(params[name], np.float32)
    return jnp.asarray(slab)


def _param(slab_ref, e, name):
    """Static-offset window of one parameter out of the packed slab (no relayout)."""
    r, c = _SPEC_DICT[name]
    off = PARAM_OFFSETS[name]
    return slab_ref[e, off:off + r, 0:c]


# ---------------- in-kernel helpers ----------------
def _layernorm(x, gamma, beta, eps=1e-12):
    mean = jnp.mean(x, axis=-1, keepdims=True)
    var = jnp.mean((x - mean) ** 2, axis=-1, keepdims=True)
    return (x - mean) * jax.lax.rsqrt(var + eps) * gamma + beta


def _encode_one(e, ids_ref, mask_ref, slab_ref):
    """One BERT encoder (static index e) -> pooled [CLS] representation (B, H)."""
    f32 = jnp.float32

    # ---- embeddings: gather folded into the kernel as one-hot @ table ----
    ids = ids_ref[e]                                              # (BS, 1) int32
    vocab_iota = jax.lax.broadcasted_iota(jnp.int32, (BS, VOCAB), 1)
    onehot = (ids == vocab_iota).astype(f32)                      # (BS, VOCAB)
    x = jnp.dot(onehot, _param(slab_ref, e, "word_emb"),
                preferred_element_type=f32)                       # (BS, H)
    x = x + _param(slab_ref, e, "pos_emb")                        # pre-tiled (BS, H)
    x = _layernorm(x, _param(slab_ref, e, "ln0_g"), _param(slab_ref, e, "ln0_b"))

    # ---- masked multi-head self-attention ----
    q = jnp.dot(x, _param(slab_ref, e, "wq"), preferred_element_type=f32) + _param(slab_ref, e, "bq")
    k = jnp.dot(x, _param(slab_ref, e, "wk"), preferred_element_type=f32) + _param(slab_ref, e, "bk")
    v = jnp.dot(x, _param(slab_ref, e, "wv"), preferred_element_type=f32) + _param(slab_ref, e, "bv")
    q3 = q.reshape(B, S, H)
    k3 = k.reshape(B, S, H)
    v3 = v.reshape(B, S, H)

    att_bias = (1.0 - mask_ref[e]) * (-1e9)                       # (B, 1, S)
    scale = 1.0 / math.sqrt(HD)
    lane = jax.lax.broadcasted_iota(jnp.int32, (1, 1, H), 2)

    # Per-head lane masks: each head's scores/context come from full-width
    # masked matmuls -> no lane-axis slicing, no concatenate, no relayouts.
    ctx3 = None
    for h in range(NH):                                           # static unroll (NH=2)
        hm = ((lane >= h * HD) & (lane < (h + 1) * HD)).astype(f32)   # (1, 1, H)
        scores = jnp.einsum("bqh,bkh->bqk", q3 * hm, k3,
                            preferred_element_type=f32) * scale       # (B, S, S)
        scores = scores + att_bias
        m = jnp.max(scores, axis=-1, keepdims=True)
        p = jnp.exp(scores - m)
        denom = jnp.sum(p, axis=-1, keepdims=True)
        p = p * pl.reciprocal(denom, approx=True)                     # EUP, not VALU divide
        part = jnp.einsum("bqk,bkh->bqh", p, v3 * hm,
                          preferred_element_type=f32)                 # (B, S, H), head-h cols
        ctx3 = part if ctx3 is None else ctx3 + part
    ctx = ctx3.reshape(BS, H)

    attn_out = jnp.dot(ctx, _param(slab_ref, e, "wo"),
                       preferred_element_type=f32) + _param(slab_ref, e, "bo")
    x = _layernorm(x + attn_out, _param(slab_ref, e, "ln1_g"), _param(slab_ref, e, "ln1_b"))

    # ---- feed forward ----
    # TODO(synk): HF BERT uses exact erf GELU; tanh approximation kept here.
    hdn = jnp.dot(x, _param(slab_ref, e, "w1"),
                  preferred_element_type=f32) + _param(slab_ref, e, "b1")
    hdn = jax.nn.gelu(hdn, approximate=True)
    ffn = jnp.dot(hdn, _param(slab_ref, e, "w2"),
                  preferred_element_type=f32) + _param(slab_ref, e, "b2")
    x = _layernorm(x + ffn, _param(slab_ref, e, "ln2_g"), _param(slab_ref, e, "ln2_b"))

    # ---- BERT pooler: tanh(W_p @ x[CLS]) ----
    # CLS rows (b * S) extracted with a constant selection matmul (MXU is idle
    # anyway; avoids strided sublane slicing).
    row = jax.lax.broadcasted_iota(jnp.int32, (B, BS), 0)
    col = jax.lax.broadcasted_iota(jnp.int32, (B, BS), 1)
    sel = (col == row * S).astype(f32)                            # (B, BS)
    cls = jnp.dot(sel, x, preferred_element_type=f32)             # (B, H)
    pooled = jnp.tanh(
        jnp.dot(cls, _param(slab_ref, e, "wp"), preferred_element_type=f32)
        + _param(slab_ref, e, "bp"))
    return pooled                                                 # (B, H)


def _protein_kernel(ids_ref, mask_ref, slab_ref, out_ref):
    # Both encoders fully fused in one grid-less invocation.
    pooled = [_encode_one(e, ids_ref, mask_ref, slab_ref) for e in range(NUM_ENC)]
    pad = jnp.zeros((B, OUT_LANES - NUM_ENC * H), jnp.float32)
    # Single lane-dense (B, 128) store: [pooled_global | pooled_local | 0-pad].
    out_ref[...] = jnp.concatenate(pooled + [pad], axis=-1)


# ---------------- pallas_call wrapper ----------------
@jax.jit
def protein_interaction_forward(param_slabs,
                                input_ids_global, attention_mask_global,
                                input_ids_local, attention_mask_local):
    """param_slabs: (NUM_ENC, SLAB_ROWS, 128) f32 -> (B, NUM_ENC*H) pooled features."""
    ids = jnp.stack([input_ids_global, input_ids_local]).astype(jnp.int32)
    ids = ids.reshape(NUM_ENC, BS, 1)
    mask = jnp.stack([attention_mask_global, attention_mask_local]).astype(jnp.float32)
    mask = mask.reshape(NUM_ENC, B, 1, S)

    pooled_pad = pl.pallas_call(
        _protein_kernel,
        out_shape=jax.ShapeDtypeStruct((B, OUT_LANES), jnp.float32),
        # no grid, no BlockSpecs: whole (tiny) problem is VMEM-resident in one shot
    )(ids, mask, param_slabs)

    # TODO(synk): reference forward() body is `pass` (unspecified); we return the
    # two BERT pooled [CLS] representations concatenated along the feature axis.
    return pooled_pad[:, : NUM_ENC * H]


# ---------------- parameter init (deterministic, synthetic) ----------------
def init_bert_params(key):
    ks = jax.random.split(key, 9)

    def dense(k, n_in, n_out):
        w = jax.random.normal(k, (n_in, n_out), jnp.float32) * 0.02
        b = jnp.zeros((1, n_out), jnp.float32)
        return w, b

    wq, bq = dense(ks[0], H, H)
    wk, bk = dense(ks[1], H, H)
    wv, bv = dense(ks[2], H, H)
    wo, bo = dense(ks[3], H, H)
    w1, b1 = dense(ks[4], H, FF)
    w2, b2 = dense(ks[5], FF, H)
    wp, bp = dense(ks[6], H, H)

    ones = jnp.ones((1, H), jnp.float32)
    zeros = jnp.zeros((1, H), jnp.float32)
    word_emb = jax.random.normal(ks[7], (VOCAB, H), jnp.float32) * 0.02
    pos_emb = jax.random.normal(ks[8], (S, H), jnp.float32) * 0.02

    params = {
        "word_emb": word_emb,
        "pos_emb": jnp.tile(pos_emb, (B, 1)),     # pre-tile over batch for the slab
        "ln0_g": ones, "ln0_b": zeros,
        "wq": wq, "bq": bq, "wk": wk, "bk": bk, "wv": wv, "bv": bv,
        "wo": wo, "bo": bo,
        "ln1_g": ones, "ln1_b": zeros,
        "w1": w1, "b1": b1, "w2": w2, "b2": b2,
        "ln2_g": ones, "ln2_b": zeros,
        "wp": wp, "bp": bp,
    }
    return pack_param_slab(params)


# ---------------- main ----------------
if __name__ == "__main__":
    key = jax.random.PRNGKey(0)
    k_pg, k_pl, k_ig, k_il = jax.random.split(key, 4)

    # one packed slab per encoder ("global", "local"), stacked along a leading axis
    param_slabs = jnp.stack([init_bert_params(k_pg), init_bert_params(k_pl)])

    input_ids_global = jax.random.randint(k_ig, (B, S), 0, VOCAB, dtype=jnp.int32)
    input_ids_local = jax.random.randint(k_il, (B, S), 0, VOCAB, dtype=jnp.int32)

    attention_mask_global = jnp.ones((B, S), jnp.float32).at[1, S - 2:].set(0.0)
    attention_mask_local = jnp.ones((B, S), jnp.float32).at[0, S - 3:].set(0.0)

    out = protein_interaction_forward(
        param_slabs,
        input_ids_global, attention_mask_global,
        input_ids_local, attention_mask_local)
    out = jax.block_until_ready(out)

    assert out.shape == (B, NUM_ENC * H), out.shape
    assert bool(jnp.all(jnp.isfinite(out)))
    print("KERNEL_OK")
</pallas_src>

<mosaic_0001>
module attributes {stable_mosaic.version = 11 : i64} {
  func.func @_protein_kernel(%arg0: memref<2x16x1xi32, #tpu.memory_space<vmem>>, %arg1: memref<2x2x1x8xf32, #tpu.memory_space<vmem>>, %arg2: memref<2x408x128xf32, #tpu.memory_space<vmem>>, %arg3: memref<2x128xf32, #tpu.memory_space<vmem>>) attributes {dimension_semantics = [], scalar_prefetch = 0 : i64, scratch_operands = 0 : i64, tpu.core_type = #tpu.core_type<tc>} {
    %c0 = arith.constant 0 : index
    %c0_0 = arith.constant 0 : index
    %c0_1 = arith.constant 0 : index
    %0 = vector.load %arg0[%c0, %c0_0, %c0_1] : memref<2x16x1xi32, #tpu.memory_space<vmem>>, vector<1x16x1xi32>
    %1 = vector.shape_cast %0 : vector<1x16x1xi32> to vector<16x1xi32>
    %2 = tpu.iota {dimensions = array<i32: 1>} : vector<16x30xi32>
    %3 = vector.broadcast %1 : vector<16x1xi32> to vector<16x30xi32>
    %4 = arith.cmpi eq, %3, %2 : vector<16x30xi32>
    %5 = arith.extui %4 : vector<16x30xi1> to vector<16x30xi32>
    %6 = arith.sitofp %5 : vector<16x30xi32> to vector<16x30xf32>
    %c0_2 = arith.constant 0 : index
    %c0_3 = arith.constant 0 : index
    %c0_4 = arith.constant 0 : index
    %7 = vector.load %arg2[%c0_2, %c0_3, %c0_4] : memref<2x408x128xf32, #tpu.memory_space<vmem>>, vector<1x30x32xf32>
    %8 = vector.shape_cast %7 : vector<1x30x32xf32> to vector<30x32xf32>
    %cst = arith.constant dense<0.000000e+00> : vector<16x32xf32>
    %9 = tpu.matmul %6, %8, %cst {dimension_numbers = #tpu.dot_dimension_numbers<[1], [0], [0], [1], [0, 0, 1, 1], [], []>} : vector<16x30xf32>, vector<30x32xf32>, vector<16x32xf32> -> vector<16x32xf32>
    %c0_5 = arith.constant 0 : index
    %c32 = arith.constant 32 : index
    %c0_6 = arith.constant 0 : index
    %10 = vector.load %arg2[%c0_5, %c32, %c0_6] : memref<2x408x128xf32, #tpu.memory_space<vmem>>, vector<1x16x32xf32>
    %11 = vector.shape_cast %10 : vector<1x16x32xf32> to vector<16x32xf32>
    %12 = arith.addf %9, %11 : vector<16x32xf32>
    %c0_7 = arith.constant 0 : index
    %c48 = arith.constant 48 : index
    %c0_8 = arith.constant 0 : index
    %13 = vector.load %arg2[%c0_7, %c48, %c0_8] : memref<2x408x128xf32, #tpu.memory_space<vmem>>, vector<1x1x32xf32>
    %14 = vector.shape_cast %13 : vector<1x1x32xf32> to vector<1x32xf32>
    %c0_9 = arith.constant 0 : index
    %c56 = arith.constant 56 : index
    %c0_10 = arith.constant 0 : index
    %15 = vector.load %arg2[%c0_9, %c56, %c0_10] : memref<2x408x128xf32, #tpu.memory_space<vmem>>, vector<1x1x32xf32>
    %16 = vector.shape_cast %15 : vector<1x1x32xf32> to vector<1x32xf32>
    %cst_11 = arith.constant dense<0.000000e+00> : vector<16xf32>
    %17 = vector.multi_reduction <add>, %12, %cst_11 [1] : vector<16x32xf32> to vector<16xf32>
    %18 = vector.shape_cast %17 : vector<16xf32> to vector<16x1xf32>
    %cst_12 = arith.constant 3.200000e+01 : f32
    %19 = vector.broadcast %cst_12 : f32 to vector<16x1xf32>
    %20 = arith.divf %18, %19 : vector<16x1xf32>
    %21 = vector.broadcast %20 : vector<16x1xf32> to vector<16x32xf32>
    %22 = arith.subf %12, %21 : vector<16x32xf32>
    %23 = arith.mulf %22, %22 : vector<16x32xf32>
    %cst_13 = arith.constant dense<0.000000e+00> : vector<16xf32>
    %24 = vector.multi_reduction <add>, %23, %cst_13 [1] : vector<16x32xf32> to vector<16xf32>
    %25 = vector.shape_cast %24 : vector<16xf32> to vector<16x1xf32>
    %cst_14 = arith.constant 3.200000e+01 : f32
    %26 = vector.broadcast %cst_14 : f32 to vector<16x1xf32>
    %27 = arith.divf %25, %26 : vector<16x1xf32>
    %28 = vector.broadcast %20 : vector<16x1xf32> to vector<16x32xf32>
    %29 = arith.subf %12, %28 : vector<16x32xf32>
    %cst_15 = arith.constant 9.99999996E-13 : f32
    %30 = vector.broadcast %cst_15 : f32 to vector<16x1xf32>
    %31 = arith.addf %27, %30 : vector<16x1xf32>
    %32 = math.rsqrt %31 : vector<16x1xf32>
    %33 = vector.broadcast %32 : vector<16x1xf32> to vector<16x32xf32>
    %34 = arith.mulf %29, %33 : vector<16x32xf32>
    %35 = vector.broadcast %14 : vector<1x32xf32> to vector<16x32xf32>
    %36 = arith.mulf %34, %35 : vector<16x32xf32>
    %37 = vector.broadcast %16 : vector<1x32xf32> to vector<16x32xf32>
    %38 = arith.addf %36, %37 : vector<16x32xf32>
    %c0_16 = arith.constant 0 : index
    %c64 = arith.constant 64 : index
    %c0_17 = arith.constant 0 : index
    %39 = vector.load %arg2[%c0_16, %c64, %c0_17] : memref<2x408x128xf32, #tpu.memory_space<vmem>>, vector<1x32x32xf32>
    %40 = vector.shape_cast %39 : vector<1x32x32xf32> to vector<32x32xf32>
    %cst_18 = arith.constant dense<0.000000e+00> : vector<16x32xf32>
    %41 = tpu.matmul %38, %40, %cst_18 {dimension_numbers = #tpu.dot_dimension_numbers<[1], [0], [0], [1], [0, 0, 1, 1], [], []>} : vector<16x32xf32>, vector<32x32xf32>, vector<16x32xf32> -> vector<16x32xf32>
    %c0_19 = arith.constant 0 : index
    %c96 = arith.constant 96 : index
    %c0_20 = arith.constant 0 : index
    %42 = vector.load %arg2[%c0_19, %c96, %c0_20] : memref<2x408x128xf32, #tpu.memory_space<vmem>>, vector<1x1x32xf32>
    %43 = vector.shape_cast %42 : vector<1x1x32xf32> to vector<1x32xf32>
    %44 = vector.broadcast %43 : vector<1x32xf32> to vector<16x32xf32>
    %45 = arith.addf %41, %44 : vector<16x32xf32>
    %c0_21 = arith.constant 0 : index
    %c104 = arith.constant 104 : index
    %c0_22 = arith.constant 0 : index
    %46 = vector.load %arg2[%c0_21, %c104, %c0_22] : memref<2x408x128xf32, #tpu.memory_space<vmem>>, vector<1x32x32xf32>
    %47 = vector.shape_cast %46 : vector<1x32x32xf32> to vector<32x32xf32>
    %cst_23 = arith.constant dense<0.000000e+00> : vector<16x32xf32>
    %48 = tpu.matmul %38, %47, %cst_23 {dimension_numbers = #tpu.dot_dimension_numbers<[1], [0], [0], [1], [0, 0, 1, 1], [], []>} : vector<16x32xf32>, vector<32x32xf32>, vector<16x32xf32> -> vector<16x32xf32>
    %c0_24 = arith.constant 0 : index
    %c136 = arith.constant 136 : index
    %c0_25 = arith.constant 0 : index
    %49 = vector.load %arg2[%c0_24, %c136, %c0_25] : memref<2x408x128xf32, #tpu.memory_space<vmem>>, vector<1x1x32xf32>
    %50 = vector.shape_cast %49 : vector<1x1x32xf32> to vector<1x32xf32>
    %51 = vector.broadcast %50 : vector<1x32xf32> to vector<16x32xf32>
    %52 = arith.addf %48, %51 : vector<16x32xf32>
    %c0_26 = arith.constant 0 : index
    %c144 = arith.constant 144 : index
    %c0_27 = arith.constant 0 : index
    %53 = vector.load %arg2[%c0_26, %c144, %c0_27] : memref<2x408x128xf32, #tpu.memory_space<vmem>>, vector<1x32x32xf32>
    %54 = vector.shape_cast %53 : vector<1x32x32xf32> to vector<32x32xf32>
    %cst_28 = arith.constant dense<0.000000e+00> : vector<16x32xf32>
    %55 = tpu.matmul %38, %54, %cst_28 {dimension_numbers = #tpu.dot_dimension_numbers<[1], [0], [0], [1], [0, 0, 1, 1], [], []>} : vector<16x32xf32>, vector<32x32xf32>, vector<16x32xf32> -> vector<16x32xf32>
    %c0_29 = arith.constant 0 : index
    %c176 = arith.constant 176 : index
    %c0_30 = arith.constant 0 : index
    %56 = vector.load %arg2[%c0_29, %c176, %c0_30] : memref<2x408x128xf32, #tpu.memory_space<vmem>>, vector<1x1x32xf32>
    %57 = vector.shape_cast %56 : vector<1x1x32xf32> to vector<1x32xf32>
    %58 = vector.broadcast %57 : vector<1x32xf32> to vector<16x32xf32>
    %59 = arith.addf %55, %58 : vector<16x32xf32>
    %60 = vector.shape_cast %45 : vector<16x32xf32> to vector<2x8x32xf32>
    %61 = vector.shape_cast %52 : vector<16x32xf32> to vector<2x8x32xf32>
    %62 = vector.shape_cast %59 : vector<16x32xf32> to vector<2x8x32xf32>
    %c0_31 = arith.constant 0 : index
    %c0_32 = arith.constant 0 : index
    %c0_33 = arith.constant 0 : index
    %c0_34 = arith.constant 0 : index
    %63 = vector.load %arg1[%c0_31, %c0_32, %c0_33, %c0_34] : memref<2x2x1x8xf32, #tpu.memory_space<vmem>>, vector<1x2x1x8xf32>
    %64 = vector.shape_cast %63 : vector<1x2x1x8xf32> to vector<2x1x8xf32>
    %cst_35 = arith.constant 1.000000e+00 : f32
    %65 = vector.broadcast %cst_35 : f32 to vector<2x1x8xf32>
    %66 = arith.subf %65, %64 : vector<2x1x8xf32>
    %cst_36 = arith.constant -1.000000e+09 : f32
    %67 = vector.broadcast %cst_36 : f32 to vector<2x1x8xf32>
    %68 = arith.mulf %66, %67 : vector<2x1x8xf32>
    %69 = tpu.iota {dimensions = array<i32: 2>} : vector<1x1x32xi32>
    %c0_i32 = arith.constant 0 : i32
    %70 = vector.broadcast %c0_i32 : i32 to vector<1x1x32xi32>
    %71 = arith.cmpi sge, %69, %70 : vector<1x1x32xi32>
    %c16_i32 = arith.constant 16 : i32
    %72 = vector.broadcast %c16_i32 : i32 to vector<1x1x32xi32>
    %73 = arith.cmpi slt, %69, %72 : vector<1x1x32xi32>
    %74 = arith.andi %71, %73 : vector<1x1x32xi1>
    %75 = arith.extui %74 : vector<1x1x32xi1> to vector<1x1x32xi32>
    %76 = arith.sitofp %75 : vector<1x1x32xi32> to vector<1x1x32xf32>
    %77 = vector.broadcast %76 : vector<1x1x32xf32> to vector<2x8x32xf32>
    %78 = arith.mulf %60, %77 : vector<2x8x32xf32>
    "tpu.trace_start"() <{level = 10 : i32, message = "bqh,bkh->bqk"}> : () -> ()
    %cst_37 = arith.constant dense<0.000000e+00> : vector<2x8x8xf32>
    %79 = tpu.matmul %78, %61, %cst_37 {dimension_numbers = #tpu.dot_dimension_numbers<[2], [2], [1], [1], [0, 0, 0, 1, 1, 1], [0], [0]>} : vector<2x8x32xf32>, vector<2x8x32xf32>, vector<2x8x8xf32> -> vector<2x8x8xf32>
    "tpu.trace_stop"() : () -> ()
    %cst_38 = arith.constant 2.500000e-01 : f32
    %80 = vector.broadcast %cst_38 : f32 to vector<2x8x8xf32>
    %81 = arith.mulf %79, %80 : vector<2x8x8xf32>
    %82 = vector.broadcast %68 : vector<2x1x8xf32> to vector<2x8x8xf32>
    %83 = arith.addf %81, %82 : vector<2x8x8xf32>
    %cst_39 = arith.constant dense<0xFF800000> : vector<2x8xf32>
    %84 = vector.multi_reduction <maximumf>, %83, %cst_39 [2] : vector<2x8x8xf32> to vector<2x8xf32>
    %85 = vector.shape_cast %84 : vector<2x8xf32> to vector<2x8x1xf32>
    %86 = vector.broadcast %85 : vector<2x8x1xf32> to vector<2x8x8xf32>
    %87 = arith.subf %83, %86 : vector<2x8x8xf32>
    %88 = math.exp %87 : vector<2x8x8xf32>
    %cst_40 = arith.constant dense<0.000000e+00> : vector<2x8xf32>
    %89 = vector.multi_reduction <add>, %88, %cst_40 [2] : vector<2x8x8xf32> to vector<2x8xf32>
    %90 = vector.shape_cast %89 : vector<2x8xf32> to vector<2x8x1xf32>
    %91 = tpu.reciprocal %90 {approx = true} : vector<2x8x1xf32> -> vector<2x8x1xf32>
    %92 = vector.broadcast %91 : vector<2x8x1xf32> to vector<2x8x8xf32>
    %93 = arith.mulf %88, %92 : vector<2x8x8xf32>
    %94 = vector.broadcast %76 : vector<1x1x32xf32> to vector<2x8x32xf32>
    %95 = arith.mulf %62, %94 : vector<2x8x32xf32>
    "tpu.trace_start"() <{level = 10 : i32, message = "bqk,bkh->bqh"}> : () -> ()
    %cst_41 = arith.constant dense<0.000000e+00> : vector<2x8x32xf32>
    %96 = tpu.matmul %93, %95, %cst_41 {dimension_numbers = #tpu.dot_dimension_numbers<[2], [1], [1], [2], [0, 0, 0, 1, 1, 2], [0], [0]>} : vector<2x8x8xf32>, vector<2x8x32xf32>, vector<2x8x32xf32> -> vector<2x8x32xf32>
    %c16_i32_42 = arith.constant 16 : i32
    "tpu.trace_stop"() : () -> ()
    %97 = vector.broadcast %c16_i32_42 : i32 to vector<1x1x32xi32>
    %98 = arith.cmpi sge, %69, %97 : vector<1x1x32xi32>
    %c32_i32 = arith.constant 32 : i32
    %99 = vector.broadcast %c32_i32 : i32 to vector<1x1x32xi32>
    %100 = arith.cmpi slt, %69, %99 : vector<1x1x32xi32>
    %101 = arith.andi %98, %100 : vector<1x1x32xi1>
    %102 = arith.extui %101 : vector<1x1x32xi1> to vector<1x1x32xi32>
    %103 = arith.sitofp %102 : vector<1x1x32xi32> to vector<1x1x32xf32>
    %104 = vector.broadcast %103 : vector<1x1x32xf32> to vector<2x8x32xf32>
    %105 = arith.mulf %60, %104 : vector<2x8x32xf32>
    "tpu.trace_start"() <{level = 10 : i32, message = "bqh,bkh->bqk"}> : () -> ()
    %cst_43 = arith.constant dense<0.000000e+00> : vector<2x8x8xf32>
    %106 = tpu.matmul %105, %61, %cst_43 {dimension_numbers = #tpu.dot_dimension_numbers<[2], [2], [1], [1], [0, 0, 0, 1, 1, 1], [0], [0]>} : vector<2x8x32xf32>, vector<2x8x32xf32>, vector<2x8x8xf32> -> vector<2x8x8xf32>
    "tpu.trace_stop"() : () -> ()
    %cst_44 = arith.constant 2.500000e-01 : f32
    %107 = vector.broadcast %cst_44 : f32 to vector<2x8x8xf32>
    %108 = arith.mulf %106, %107 : vector<2x8x8xf32>
    %109 = vector.broadcast %68 : vector<2x1x8xf32> to vector<2x8x8xf32>
    %110 = arith.addf %108, %109 : vector<2x8x8xf32>
    %cst_45 = arith.constant dense<0xFF800000> : vector<2x8xf32>
    %111 = vector.multi_reduction <maximumf>, %110, %cst_45 [2] : vector<2x8x8xf32> to vector<2x8xf32>
    %112 = vector.shape_cast %111 : vector<2x8xf32> to vector<2x8x1xf32>
    %113 = vector.broadcast %112 : vector<2x8x1xf32> to vector<2x8x8xf32>
    %114 = arith.subf %110, %113 : vector<2x8x8xf32>
    %115 = math.exp %114 : vector<2x8x8xf32>
    %cst_46 = arith.constant dense<0.000000e+00> : vector<2x8xf32>
    %116 = vector.multi_reduction <add>, %115, %cst_46 [2] : vector<2x8x8xf32> to vector<2x8xf32>
    %117 = vector.shape_cast %116 : vector<2x8xf32> to vector<2x8x1xf32>
    %118 = tpu.reciprocal %117 {approx = true} : vector<2x8x1xf32> -> vector<2x8x1xf32>
    %119 = vector.broadcast %118 : vector<2x8x1xf32> to vector<2x8x8xf32>
    %120 = arith.mulf %115, %119 : vector<2x8x8xf32>
    %121 = vector.broadcast %103 : vector<1x1x32xf32> to vector<2x8x32xf32>
    %122 = arith.mulf %62, %121 : vector<2x8x32xf32>
    "tpu.trace_start"() <{level = 10 : i32, message = "bqk,bkh->bqh"}> : () -> ()
    %cst_47 = arith.constant dense<0.000000e+00> : vector<2x8x32xf32>
    %123 = tpu.matmul %120, %122, %cst_47 {dimension_numbers = #tpu.dot_dimension_numbers<[2], [1], [1], [2], [0, 0, 0, 1, 1, 2], [0], [0]>} : vector<2x8x8xf32>, vector<2x8x32xf32>, vector<2x8x32xf32> -> vector<2x8x32xf32>
    "tpu.trace_stop"() : () -> ()
    %124 = arith.addf %96, %123 : vector<2x8x32xf32>
    %125 = vector.shape_cast %124 : vector<2x8x32xf32> to vector<16x32xf32>
    %c0_48 = arith.constant 0 : index
    %c184 = arith.constant 184 : index
    %c0_49 = arith.constant 0 : index
    %126 = vector.load %arg2[%c0_48, %c184, %c0_49] : memref<2x408x128xf32, #tpu.memory_space<vmem>>, vector<1x32x32xf32>
    %127 = vector.shape_cast %126 : vector<1x32x32xf32> to vector<32x32xf32>
    %cst_50 = arith.constant dense<0.000000e+00> : vector<16x32xf32>
    %128 = tpu.matmul %125, %127, %cst_50 {dimension_numbers = #tpu.dot_dimension_numbers<[1], [0], [0], [1], [0, 0, 1, 1], [], []>} : vector<16x32xf32>, vector<32x32xf32>, vector<16x32xf32> -> vector<16x32xf32>
    %c0_51 = arith.constant 0 : index
    %c216 = arith.constant 216 : index
    %c0_52 = arith.constant 0 : index
    %129 = vector.load %arg2[%c0_51, %c216, %c0_52] : memref<2x408x128xf32, #tpu.memory_space<vmem>>, vector<1x1x32xf32>
    %130 = vector.shape_cast %129 : vector<1x1x32xf32> to vector<1x32xf32>
    %131 = vector.broadcast %130 : vector<1x32xf32> to vector<16x32xf32>
    %132 = arith.addf %128, %131 : vector<16x32xf32>
    %133 = arith.addf %38, %132 : vector<16x32xf32>
    %c0_53 = arith.constant 0 : index
    %c224 = arith.constant 224 : index
    %c0_54 = arith.constant 0 : index
    %134 = vector.load %arg2[%c0_53, %c224, %c0_54] : memref<2x408x128xf32, #tpu.memory_space<vmem>>, vector<1x1x32xf32>
    %135 = vector.shape_cast %134 : vector<1x1x32xf32> to vector<1x32xf32>
    %c0_55 = arith.constant 0 : index
    %c232 = arith.constant 232 : index
    %c0_56 = arith.constant 0 : index
    %136 = vector.load %arg2[%c0_55, %c232, %c0_56] : memref<2x408x128xf32, #tpu.memory_space<vmem>>, vector<1x1x32xf32>
    %137 = vector.shape_cast %136 : vector<1x1x32xf32> to vector<1x32xf32>
    %cst_57 = arith.constant dense<0.000000e+00> : vector<16xf32>
    %138 = vector.multi_reduction <add>, %133, %cst_57 [1] : vector<16x32xf32> to vector<16xf32>
    %139 = vector.shape_cast %138 : vector<16xf32> to vector<16x1xf32>
    %cst_58 = arith.constant 3.200000e+01 : f32
    %140 = vector.broadcast %cst_58 : f32 to vector<16x1xf32>
    %141 = arith.divf %139, %140 : vector<16x1xf32>
    %142 = vector.broadcast %141 : vector<16x1xf32> to vector<16x32xf32>
    %143 = arith.subf %133, %142 : vector<16x32xf32>
    %144 = arith.mulf %143, %143 : vector<16x32xf32>
    %cst_59 = arith.constant dense<0.000000e+00> : vector<16xf32>
    %145 = vector.multi_reduction <add>, %144, %cst_59 [1] : vector<16x32xf32> to vector<16xf32>
    %146 = vector.shape_cast %145 : vector<16xf32> to vector<16x1xf32>
    %cst_60 = arith.constant 3.200000e+01 : f32
    %147 = vector.broadcast %cst_60 : f32 to vector<16x1xf32>
    %148 = arith.divf %146, %147 : vector<16x1xf32>
    %149 = vector.broadcast %141 : vector<16x1xf32> to vector<16x32xf32>
    %150 = arith.subf %133, %149 : vector<16x32xf32>
    %cst_61 = arith.constant 9.99999996E-13 : f32
    %151 = vector.broadcast %cst_61 : f32 to vector<16x1xf32>
    %152 = arith.addf %148, %151 : vector<16x1xf32>
    %153 = math.rsqrt %152 : vector<16x1xf32>
    %154 = vector.broadcast %153 : vector<16x1xf32> to vector<16x32xf32>
    %155 = arith.mulf %150, %154 : vector<16x32xf32>
    %156 = vector.broadcast %135 : vector<1x32xf32> to vector<16x32xf32>
    %157 = arith.mulf %155, %156 : vector<16x32xf32>
    %158 = vector.broadcast %137 : vector<1x32xf32> to vector<16x32xf32>
    %159 = arith.addf %157, %158 : vector<16x32xf32>
    %c0_62 = arith.constant 0 : index
    %c240 = arith.constant 240 : index
    %c0_63 = arith.constant 0 : index
    %160 = vector.load %arg2[%c0_62, %c240, %c0_63] : memref<2x408x128xf32, #tpu.memory_space<vmem>>, vector<1x32x64xf32>
    %161 = vector.shape_cast %160 : vector<1x32x64xf32> to vector<32x64xf32>
    %cst_64 = arith.constant dense<0.000000e+00> : vector<16x64xf32>
    %162 = tpu.matmul %159, %161, %cst_64 {dimension_numbers = #tpu.dot_dimension_numbers<[1], [0], [0], [1], [0, 0, 1, 1], [], []>} : vector<16x32xf32>, vector<32x64xf32>, vector<16x64xf32> -> vector<16x64xf32>
    %c0_65 = arith.constant 0 : index
    %c272 = arith.constant 272 : index
    %c0_66 = arith.constant 0 : index
    %163 = vector.load %arg2[%c0_65, %c272, %c0_66] : memref<2x408x128xf32, #tpu.memory_space<vmem>>, vector<1x1x64xf32>
    %164 = vector.shape_cast %163 : vector<1x1x64xf32> to vector<1x64xf32>
    %165 = vector.broadcast %164 : vector<1x64xf32> to vector<16x64xf32>
    %166 = arith.addf %162, %165 : vector<16x64xf32>
    %167 = arith.mulf %166, %166 : vector<16x64xf32>
    %168 = arith.mulf %166, %167 : vector<16x64xf32>
    %cst_67 = arith.constant 4.471500e-02 : f32
    %169 = vector.broadcast %cst_67 : f32 to vector<16x64xf32>
    %170 = arith.mulf %169, %168 : vector<16x64xf32>
    %171 = arith.addf %166, %170 : vector<16x64xf32>
    %cst_68 = arith.constant 0.797884583 : f32
    %172 = vector.broadcast %cst_68 : f32 to vector<16x64xf32>
    %173 = arith.mulf %172, %171 : vector<16x64xf32>
    %174 = math.tanh %173 : vector<16x64xf32>
    %cst_69 = arith.constant 1.000000e+00 : f32
    %175 = vector.broadcast %cst_69 : f32 to vector<16x64xf32>
    %176 = arith.addf %175, %174 : vector<16x64xf32>
    %cst_70 = arith.constant 5.000000e-01 : f32
    %177 = vector.broadcast %cst_70 : f32 to vector<16x64xf32>
    %178 = arith.mulf %177, %176 : vector<16x64xf32>
    %179 = arith.mulf %166, %178 : vector<16x64xf32>
    %c0_71 = arith.constant 0 : index
    %c280 = arith.constant 280 : index
    %c0_72 = arith.constant 0 : index
    %180 = vector.load %arg2[%c0_71, %c280, %c0_72] : memref<2x408x128xf32, #tpu.memory_space<vmem>>, vector<1x64x32xf32>
    %181 = vector.shape_cast %180 : vector<1x64x32xf32> to vector<64x32xf32>
    %cst_73 = arith.constant dense<0.000000e+00> : vector<16x32xf32>
    %182 = tpu.matmul %179, %181, %cst_73 {dimension_numbers = #tpu.dot_dimension_numbers<[1], [0], [0], [1], [0, 0, 1, 1], [], []>} : vector<16x64xf32>, vector<64x32xf32>, vector<16x32xf32> -> vector<16x32xf32>
    %c0_74 = arith.constant 0 : index
    %c344 = arith.constant 344 : index
    %c0_75 = arith.constant 0 : index
    %183 = vector.load %arg2[%c0_74, %c344, %c0_75] : memref<2x408x128xf32, #tpu.memory_space<vmem>>, vector<1x1x32xf32>
    %184 = vector.shape_cast %183 : vector<1x1x32xf32> to vector<1x32xf32>
    %185 = vector.broadcast %184 : vector<1x32xf32> to vector<16x32xf32>
    %186 = arith.addf %182, %185 : vector<16x32xf32>
    %187 = arith.addf %159, %186 : vector<16x32xf32>
    %c0_76 = arith.constant 0 : index
    %c352 = arith.constant 352 : index
    %c0_77 = arith.constant 0 : index
    %188 = vector.load %arg2[%c0_76, %c352, %c0_77] : memref<2x408x128xf32, #tpu.memory_space<vmem>>, vector<1x1x32xf32>
    %189 = vector.shape_cast %188 : vector<1x1x32xf32> to vector<1x32xf32>
    %c0_78 = arith.constant 0 : index
    %c360 = arith.constant 360 : index
    %c0_79 = arith.constant 0 : index
    %190 = vector.load %arg2[%c0_78, %c360, %c0_79] : memref<2x408x128xf32, #tpu.memory_space<vmem>>, vector<1x1x32xf32>
    %191 = vector.shape_cast %190 : vector<1x1x32xf32> to vector<1x32xf32>
    %cst_80 = arith.constant dense<0.000000e+00> : vector<16xf32>
    %192 = vector.multi_reduction <add>, %187, %cst_80 [1] : vector<16x32xf32> to vector<16xf32>
    %193 = vector.shape_cast %192 : vector<16xf32> to vector<16x1xf32>
    %cst_81 = arith.constant 3.200000e+01 : f32
    %194 = vector.broadcast %cst_81 : f32 to vector<16x1xf32>
    %195 = arith.divf %193, %194 : vector<16x1xf32>
    %196 = vector.broadcast %195 : vector<16x1xf32> to vector<16x32xf32>
    %197 = arith.subf %187, %196 : vector<16x32xf32>
    %198 = arith.mulf %197, %197 : vector<16x32xf32>
    %cst_82 = arith.constant dense<0.000000e+00> : vector<16xf32>
    %199 = vector.multi_reduction <add>, %198, %cst_82 [1] : vector<16x32xf32> to vector<16xf32>
    %200 = vector.shape_cast %199 : vector<16xf32> to vector<16x1xf32>
    %cst_83 = arith.constant 3.200000e+01 : f32
    %201 = vector.broadcast %cst_83 : f32 to vector<16x1xf32>
    %202 = arith.divf %200, %201 : vector<16x1xf32>
    %203 = vector.broadcast %195 : vector<16x1xf32> to vector<16x32xf32>
    %204 = arith.subf %187, %203 : vector<16x32xf32>
    %cst_84 = arith.constant 9.99999996E-13 : f32
    %205 = vector.broadcast %cst_84 : f32 to vector<16x1xf32>
    %206 = arith.addf %202, %205 : vector<16x1xf32>
    %207 = math.rsqrt %206 : vector<16x1xf32>
    %208 = vector.broadcast %207 : vector<16x1xf32> to vector<16x32xf32>
    %209 = arith.mulf %204, %208 : vector<16x32xf32>
    %210 = vector.broadcast %189 : vector<1x32xf32> to vector<16x32xf32>
    %211 = arith.mulf %209, %210 : vector<16x32xf32>
    %212 = vector.broadcast %191 : vector<1x32xf32> to vector<16x32xf32>
    %213 = arith.addf %211, %212 : vector<16x32xf32>
    %214 = tpu.iota {dimensions = array<i32: 0>} : vector<2x16xi32>
    %215 = tpu.iota {dimensions = array<i32: 1>} : vector<2x16xi32>
    %c8_i32 = arith.constant 8 : i32
    %216 = vector.broadcast %c8_i32 : i32 to vector<2x16xi32>
    %217 = arith.muli %214, %216 : vector<2x16xi32>
    %218 = arith.cmpi eq, %215, %217 : vector<2x16xi32>
    %219 = arith.extui %218 : vector<2x16xi1> to vector<2x16xi32>
    %220 = arith.sitofp %219 : vector<2x16xi32> to vector<2x16xf32>
    %cst_85 = arith.constant dense<0.000000e+00> : vector<2x32xf32>
    %221 = tpu.matmul %220, %213, %cst_85 {dimension_numbers = #tpu.dot_dimension_numbers<[1], [0], [0], [1], [0, 0, 1, 1], [], []>} : vector<2x16xf32>, vector<16x32xf32>, vector<2x32xf32> -> vector<2x32xf32>
    %c0_86 = arith.constant 0 : index
    %c368 = arith.constant 368 : index
    %c0_87 = arith.constant 0 : index
    %222 = vector.load %arg2[%c0_86, %c368, %c0_87] : memref<2x408x128xf32, #tpu.memory_space<vmem>>, vector<1x32x32xf32>
    %223 = vector.shape_cast %222 : vector<1x32x32xf32> to vector<32x32xf32>
    %cst_88 = arith.constant dense<0.000000e+00> : vector<2x32xf32>
    %224 = tpu.matmul %221, %223, %cst_88 {dimension_numbers = #tpu.dot_dimension_numbers<[1], [0], [0], [1], [0, 0, 1, 1], [], []>} : vector<2x32xf32>, vector<32x32xf32>, vector<2x32xf32> -> vector<2x32xf32>
    %c0_89 = arith.constant 0 : index
    %c400 = arith.constant 400 : index
    %c0_90 = arith.constant 0 : index
    %225 = vector.load %arg2[%c0_89, %c400, %c0_90] : memref<2x408x128xf32, #tpu.memory_space<vmem>>, vector<1x1x32xf32>
    %226 = vector.shape_cast %225 : vector<1x1x32xf32> to vector<1x32xf32>
    %227 = vector.broadcast %226 : vector<1x32xf32> to vector<2x32xf32>
    %228 = arith.addf %224, %227 : vector<2x32xf32>
    %229 = math.tanh %228 : vector<2x32xf32>
    %c1 = arith.constant 1 : index
    %c0_91 = arith.constant 0 : index
    %c0_92 = arith.constant 0 : index
    %230 = vector.load %arg0[%c1, %c0_91, %c0_92] : memref<2x16x1xi32, #tpu.memory_space<vmem>>, vector<1x16x1xi32>
    %231 = vector.shape_cast %230 : vector<1x16x1xi32> to vector<16x1xi32>
    %232 = tpu.iota {dimensions = array<i32: 1>} : vector<16x30xi32>
    %233 = vector.broadcast %231 : vector<16x1xi32> to vector<16x30xi32>
    %234 = arith.cmpi eq, %233, %232 : vector<16x30xi32>
    %235 = arith.extui %234 : vector<16x30xi1> to vector<16x30xi32>
    %236 = arith.sitofp %235 : vector<16x30xi32> to vector<16x30xf32>
    %c1_93 = arith.constant 1 : index
    %c0_94 = arith.constant 0 : index
    %c0_95 = arith.constant 0 : index
    %237 = vector.load %arg2[%c1_93, %c0_94, %c0_95] : memref<2x408x128xf32, #tpu.memory_space<vmem>>, vector<1x30x32xf32>
    %238 = vector.shape_cast %237 : vector<1x30x32xf32> to vector<30x32xf32>
    %cst_96 = arith.constant dense<0.000000e+00> : vector<16x32xf32>
    %239 = tpu.matmul %236, %238, %cst_96 {dimension_numbers = #tpu.dot_dimension_numbers<[1], [0], [0], [1], [0, 0, 1, 1], [], []>} : vector<16x30xf32>, vector<30x32xf32>, vector<16x32xf32> -> vector<16x32xf32>
    %c1_97 = arith.constant 1 : index
    %c32_98 = arith.constant 32 : index
    %c0_99 = arith.constant 0 : index
    %240 = vector.load %arg2[%c1_97, %c32_98, %c0_99] : memref<2x408x128xf32, #tpu.memory_space<vmem>>, vector<1x16x32xf32>
    %241 = vector.shape_cast %240 : vector<1x16x32xf32> to vector<16x32xf32>
    %242 = arith.addf %239, %241 : vector<16x32xf32>
    %c1_100 = arith.constant 1 : index
    %c48_101 = arith.constant 48 : index
    %c0_102 = arith.constant 0 : index
    %243 = vector.load %arg2[%c1_100, %c48_101, %c0_102] : memref<2x408x128xf32, #tpu.memory_space<vmem>>, vector<1x1x32xf32>
    %244 = vector.shape_cast %243 : vector<1x1x32xf32> to vector<1x32xf32>
    %c1_103 = arith.constant 1 : index
    %c56_104 = arith.constant 56 : index
    %c0_105 = arith.constant 0 : index
    %245 = vector.load %arg2[%c1_103, %c56_104, %c0_105] : memref<2x408x128xf32, #tpu.memory_space<vmem>>, vector<1x1x32xf32>
    %246 = vector.shape_cast %245 : vector<1x1x32xf32> to vector<1x32xf32>
    %cst_106 = arith.constant dense<0.000000e+00> : vector<16xf32>
    %247 = vector.multi_reduction <add>, %242, %cst_106 [1] : vector<16x32xf32> to vector<16xf32>
    %248 = vector.shape_cast %247 : vector<16xf32> to vector<16x1xf32>
    %cst_107 = arith.constant 3.200000e+01 : f32
    %249 = vector.broadcast %cst_107 : f32 to vector<16x1xf32>
    %250 = arith.divf %248, %249 : vector<16x1xf32>
    %251 = vector.broadcast %250 : vector<16x1xf32> to vector<16x32xf32>
    %252 = arith.subf %242, %251 : vector<16x32xf32>
    %253 = arith.mulf %252, %252 : vector<16x32xf32>
    %cst_108 = arith.constant dense<0.000000e+00> : vector<16xf32>
    %254 = vector.multi_reduction <add>, %253, %cst_108 [1] : vector<16x32xf32> to vector<16xf32>
    %255 = vector.shape_cast %254 : vector<16xf32> to vector<16x1xf32>
    %cst_109 = arith.constant 3.200000e+01 : f32
    %256 = vector.broadcast %cst_109 : f32 to vector<16x1xf32>
    %257 = arith.divf %255, %256 : vector<16x1xf32>
    %258 = vector.broadcast %250 : vector<16x1xf32> to vector<16x32xf32>
    %259 = arith.subf %242, %258 : vector<16x32xf32>
    %cst_110 = arith.constant 9.99999996E-13 : f32
    %260 = vector.broadcast %cst_110 : f32 to vector<16x1xf32>
    %261 = arith.addf %257, %260 : vector<16x1xf32>
    %262 = math.rsqrt %261 : vector<16x1xf32>
    %263 = vector.broadcast %262 : vector<16x1xf32> to vector<16x32xf32>
    %264 = arith.mulf %259, %263 : vector<16x32xf32>
    %265 = vector.broadcast %244 : vector<1x32xf32> to vector<16x32xf32>
    %266 = arith.mulf %264, %265 : vector<16x32xf32>
    %267 = vector.broadcast %246 : vector<1x32xf32> to vector<16x32xf32>
    %268 = arith.addf %266, %267 : vector<16x32xf32>
    %c1_111 = arith.constant 1 : index
    %c64_112 = arith.constant 64 : index
    %c0_113 = arith.constant 0 : index
    %269 = vector.load %arg2[%c1_111, %c64_112, %c0_113] : memref<2x408x128xf32, #tpu.memory_space<vmem>>, vector<1x32x32xf32>
    %270 = vector.shape_cast %269 : vector<1x32x32xf32> to vector<32x32xf32>
    %cst_114 = arith.constant dense<0.000000e+00> : vector<16x32xf32>
    %271 = tpu.matmul %268, %270, %cst_114 {dimension_numbers = #tpu.dot_dimension_numbers<[1], [0], [0], [1], [0, 0, 1, 1], [], []>} : vector<16x32xf32>, vector<32x32xf32>, vector<16x32xf32> -> vector<16x32xf32>
    %c1_115 = arith.constant 1 : index
    %c96_116 = arith.constant 96 : index
    %c0_117 = arith.constant 0 : index
    %272 = vector.load %arg2[%c1_115, %c96_116, %c0_117] : memref<2x408x128xf32, #tpu.memory_space<vmem>>, vector<1x1x32xf32>
    %273 = vector.shape_cast %272 : vector<1x1x32xf32> to vector<1x32xf32>
    %274 = vector.broadcast %273 : vector<1x32xf32> to vector<16x32xf32>
    %275 = arith.addf %271, %274 : vector<16x32xf32>
    %c1_118 = arith.constant 1 : index
    %c104_119 = arith.constant 104 : index
    %c0_120 = arith.constant 0 : index
    %276 = vector.load %arg2[%c1_118, %c104_119, %c0_120] : memref<2x408x128xf32, #tpu.memory_space<vmem>>, vector<1x32x32xf32>
    %277 = vector.shape_cast %276 : vector<1x32x32xf32> to vector<32x32xf32>
    %cst_121 = arith.constant dense<0.000000e+00> : vector<16x32xf32>
    %278 = tpu.matmul %268, %277, %cst_121 {dimension_numbers = #tpu.dot_dimension_numbers<[1], [0], [0], [1], [0, 0, 1, 1], [], []>} : vector<16x32xf32>, vector<32x32xf32>, vector<16x32xf32> -> vector<16x32xf32>
    %c1_122 = arith.constant 1 : index
    %c136_123 = arith.constant 136 : index
    %c0_124 = arith.constant 0 : index
    %279 = vector.load %arg2[%c1_122, %c136_123, %c0_124] : memref<2x408x128xf32, #tpu.memory_space<vmem>>, vector<1x1x32xf32>
    %280 = vector.shape_cast %279 : vector<1x1x32xf32> to vector<1x32xf32>
    %281 = vector.broadcast %280 : vector<1x32xf32> to vector<16x32xf32>
    %282 = arith.addf %278, %281 : vector<16x32xf32>
    %c1_125 = arith.constant 1 : index
    %c144_126 = arith.constant 144 : index
    %c0_127 = arith.constant 0 : index
    %283 = vector.load %arg2[%c1_125, %c144_126, %c0_127] : memref<2x408x128xf32, #tpu.memory_space<vmem>>, vector<1x32x32xf32>
    %284 = vector.shape_cast %283 : vector<1x32x32xf32> to vector<32x32xf32>
    %cst_128 = arith.constant dense<0.000000e+00> : vector<16x32xf32>
    %285 = tpu.matmul %268, %284, %cst_128 {dimension_numbers = #tpu.dot_dimension_numbers<[1], [0], [0], [1], [0, 0, 1, 1], [], []>} : vector<16x32xf32>, vector<32x32xf32>, vector<16x32xf32> -> vector<16x32xf32>
    %c1_129 = arith.constant 1 : index
    %c176_130 = arith.constant 176 : index
    %c0_131 = arith.constant 0 : index
    %286 = vector.load %arg2[%c1_129, %c176_130, %c0_131] : memref<2x408x128xf32, #tpu.memory_space<vmem>>, vector<1x1x32xf32>
    %287 = vector.shape_cast %286 : vector<1x1x32xf32> to vector<1x32xf32>
    %288 = vector.broadcast %287 : vector<1x32xf32> to vector<16x32xf32>
    %289 = arith.addf %285, %288 : vector<16x32xf32>
    %290 = vector.shape_cast %275 : vector<16x32xf32> to vector<2x8x32xf32>
    %291 = vector.shape_cast %282 : vector<16x32xf32> to vector<2x8x32xf32>
    %292 = vector.shape_cast %289 : vector<16x32xf32> to vector<2x8x32xf32>
    %c1_132 = arith.constant 1 : index
    %c0_133 = arith.constant 0 : index
    %c0_134 = arith.constant 0 : index
    %c0_135 = arith.constant 0 : index
    %293 = vector.load %arg1[%c1_132, %c0_133, %c0_134, %c0_135] : memref<2x2x1x8xf32, #tpu.memory_space<vmem>>, vector<1x2x1x8xf32>
    %294 = vector.shape_cast %293 : vector<1x2x1x8xf32> to vector<2x1x8xf32>
    %cst_136 = arith.constant 1.000000e+00 : f32
    %295 = vector.broadcast %cst_136 : f32 to vector<2x1x8xf32>
    %296 = arith.subf %295, %294 : vector<2x1x8xf32>
    %cst_137 = arith.constant -1.000000e+09 : f32
    %297 = vector.broadcast %cst_137 : f32 to vector<2x1x8xf32>
    %298 = arith.mulf %296, %297 : vector<2x1x8xf32>
    %299 = tpu.iota {dimensions = array<i32: 2>} : vector<1x1x32xi32>
    %c0_i32_138 = arith.constant 0 : i32
    %300 = vector.broadcast %c0_i32_138 : i32 to vector<1x1x32xi32>
    %301 = arith.cmpi sge, %299, %300 : vector<1x1x32xi32>
    %c16_i32_139 = arith.constant 16 : i32
    %302 = vector.broadcast %c16_i32_139 : i32 to vector<1x1x32xi32>
    %303 = arith.cmpi slt, %299, %302 : vector<1x1x32xi32>
    %304 = arith.andi %301, %303 : vector<1x1x32xi1>
    %305 = arith.extui %304 : vector<1x1x32xi1> to vector<1x1x32xi32>
    %306 = arith.sitofp %305 : vector<1x1x32xi32> to vector<1x1x32xf32>
    %307 = vector.broadcast %306 : vector<1x1x32xf32> to vector<2x8x32xf32>
    %308 = arith.mulf %290, %307 : vector<2x8x32xf32>
    "tpu.trace_start"() <{level = 10 : i32, message = "bqh,bkh->bqk"}> : () -> ()
    %cst_140 = arith.constant dense<0.000000e+00> : vector<2x8x8xf32>
    %309 = tpu.matmul %308, %291, %cst_140 {dimension_numbers = #tpu.dot_dimension_numbers<[2], [2], [1], [1], [0, 0, 0, 1, 1, 1], [0], [0]>} : vector<2x8x32xf32>, vector<2x8x32xf32>, vector<2x8x8xf32> -> vector<2x8x8xf32>
    "tpu.trace_stop"() : () -> ()
    %cst_141 = arith.constant 2.500000e-01 : f32
    %310 = vector.broadcast %cst_141 : f32 to vector<2x8x8xf32>
    %311 = arith.mulf %309, %310 : vector<2x8x8xf32>
    %312 = vector.broadcast %298 : vector<2x1x8xf32> to vector<2x8x8xf32>
    %313 = arith.addf %311, %312 : vector<2x8x8xf32>
    %cst_142 = arith.constant dense<0xFF800000> : vector<2x8xf32>
    %314 = vector.multi_reduction <maximumf>, %313, %cst_142 [2] : vector<2x8x8xf32> to vector<2x8xf32>
    %315 = vector.shape_cast %314 : vector<2x8xf32> to vector<2x8x1xf32>
    %316 = vector.broadcast %315 : vector<2x8x1xf32> to vector<2x8x8xf32>
    %317 = arith.subf %313, %316 : vector<2x8x8xf32>
    %318 = math.exp %317 : vector<2x8x8xf32>
    %cst_143 = arith.constant dense<0.000000e+00> : vector<2x8xf32>
    %319 = vector.multi_reduction <add>, %318, %cst_143 [2] : vector<2x8x8xf32> to vector<2x8xf32>
    %320 = vector.shape_cast %319 : vector<2x8xf32> to vector<2x8x1xf32>
    %321 = tpu.reciprocal %320 {approx = true} : vector<2x8x1xf32> -> vector<2x8x1xf32>
    %322 = vector.broadcast %321 : vector<2x8x1xf32> to vector<2x8x8xf32>
    %323 = arith.mulf %318, %322 : vector<2x8x8xf32>
    %324 = vector.broadcast %306 : vector<1x1x32xf32> to vector<2x8x32xf32>
    %325 = arith.mulf %292, %324 : vector<2x8x32xf32>
    "tpu.trace_start"() <{level = 10 : i32, message = "bqk,bkh->bqh"}> : () -> ()
    %cst_144 = arith.constant dense<0.000000e+00> : vector<2x8x32xf32>
    %326 = tpu.matmul %323, %325, %cst_144 {dimension_numbers = #tpu.dot_dimension_numbers<[2], [1], [1], [2], [0, 0, 0, 1, 1, 2], [0], [0]>} : vector<2x8x8xf32>, vector<2x8x32xf32>, vector<2x8x32xf32> -> vector<2x8x32xf32>
    %c16_i32_145 = arith.constant 16 : i32
    "tpu.trace_stop"() : () -> ()
    %327 = vector.broadcast %c16_i32_145 : i32 to vector<1x1x32xi32>
    %328 = arith.cmpi sge, %299, %327 : vector<1x1x32xi32>
    %c32_i32_146 = arith.constant 32 : i32
    %329 = vector.broadcast %c32_i32_146 : i32 to vector<1x1x32xi32>
    %330 = arith.cmpi slt, %299, %329 : vector<1x1x32xi32>
    %331 = arith.andi %328, %330 : vector<1x1x32xi1>
    %332 = arith.extui %331 : vector<1x1x32xi1> to vector<1x1x32xi32>
    %333 = arith.sitofp %332 : vector<1x1x32xi32> to vector<1x1x32xf32>
    %334 = vector.broadcast %333 : vector<1x1x32xf32> to vector<2x8x32xf32>
    %335 = arith.mulf %290, %334 : vector<2x8x32xf32>
    "tpu.trace_start"() <{level = 10 : i32, message = "bqh,bkh->bqk"}> : () -> ()
    %cst_147 = arith.constant dense<0.000000e+00> : vector<2x8x8xf32>
    %336 = tpu.matmul %335, %291, %cst_147 {dimension_numbers = #tpu.dot_dimension_numbers<[2], [2], [1], [1], [0, 0, 0, 1, 1, 1], [0], [0]>} : vector<2x8x32xf32>, vector<2x8x32xf32>, vector<2x8x8xf32> -> vector<2x8x8xf32>
    "tpu.trace_stop"() : () -> ()
    %cst_148 = arith.constant 2.500000e-01 : f32
    %337 = vector.broadcast %cst_148 : f32 to vector<2x8x8xf32>
    %338 = arith.mulf %336, %337 : vector<2x8x8xf32>
    %339 = vector.broadcast %298 : vector<2x1x8xf32> to vector<2x8x8xf32>
    %340 = arith.addf %338, %339 : vector<2x8x8xf32>
    %cst_149 = arith.constant dense<0xFF800000> : vector<2x8xf32>
    %341 = vector.multi_reduction <maximumf>, %340, %cst_149 [2] : vector<2x8x8xf32> to vector<2x8xf32>
    %342 = vector.shape_cast %341 : vector<2x8xf32> to vector<2x8x1xf32>
    %343 = vector.broadcast %342 : vector<2x8x1xf32> to vector<2x8x8xf32>
    %344 = arith.subf %340, %343 : vector<2x8x8xf32>
    %345 = math.exp %344 : vector<2x8x8xf32>
    %cst_150 = arith.constant dense<0.000000e+00> : vector<2x8xf32>
    %346 = vector.multi_reduction <add>, %345, %cst_150 [2] : vector<2x8x8xf32> to vector<2x8xf32>
    %347 = vector.shape_cast %346 : vector<2x8xf32> to vector<2x8x1xf32>
    %348 = tpu.reciprocal %347 {approx = true} : vector<2x8x1xf32> -> vector<2x8x1xf32>
    %349 = vector.broadcast %348 : vector<2x8x1xf32> to vector<2x8x8xf32>
    %350 = arith.mulf %345, %349 : vector<2x8x8xf32>
    %351 = vector.broadcast %333 : vector<1x1x32xf32> to vector<2x8x32xf32>
    %352 = arith.mulf %292, %351 : vector<2x8x32xf32>
    "tpu.trace_start"() <{level = 10 : i32, message = "bqk,bkh->bqh"}> : () -> ()
    %cst_151 = arith.constant dense<0.000000e+00> : vector<2x8x32xf32>
    %353 = tpu.matmul %350, %352, %cst_151 {dimension_numbers = #tpu.dot_dimension_numbers<[2], [1], [1], [2], [0, 0, 0, 1, 1, 2], [0], [0]>} : vector<2x8x8xf32>, vector<2x8x32xf32>, vector<2x8x32xf32> -> vector<2x8x32xf32>
    "tpu.trace_stop"() : () -> ()
    %354 = arith.addf %326, %353 : vector<2x8x32xf32>
    %355 = vector.shape_cast %354 : vector<2x8x32xf32> to vector<16x32xf32>
    %c1_152 = arith.constant 1 : index
    %c184_153 = arith.constant 184 : index
    %c0_154 = arith.constant 0 : index
    %356 = vector.load %arg2[%c1_152, %c184_153, %c0_154] : memref<2x408x128xf32, #tpu.memory_space<vmem>>, vector<1x32x32xf32>
    %357 = vector.shape_cast %356 : vector<1x32x32xf32> to vector<32x32xf32>
    %cst_155 = arith.constant dense<0.000000e+00> : vector<16x32xf32>
    %358 = tpu.matmul %355, %357, %cst_155 {dimension_numbers = #tpu.dot_dimension_numbers<[1], [0], [0], [1], [0, 0, 1, 1], [], []>} : vector<16x32xf32>, vector<32x32xf32>, vector<16x32xf32> -> vector<16x32xf32>
    %c1_156 = arith.constant 1 : index
    %c216_157 = arith.constant 216 : index
    %c0_158 = arith.constant 0 : index
    %359 = vector.load %arg2[%c1_156, %c216_157, %c0_158] : memref<2x408x128xf32, #tpu.memory_space<vmem>>, vector<1x1x32xf32>
    %360 = vector.shape_cast %359 : vector<1x1x32xf32> to vector<1x32xf32>
    %361 = vector.broadcast %360 : vector<1x32xf32> to vector<16x32xf32>
    %362 = arith.addf %358, %361 : vector<16x32xf32>
    %363 = arith.addf %268, %362 : vector<16x32xf32>
    %c1_159 = arith.constant 1 : index
    %c224_160 = arith.constant 224 : index
    %c0_161 = arith.constant 0 : index
    %364 = vector.load %arg2[%c1_159, %c224_160, %c0_161] : memref<2x408x128xf32, #tpu.memory_space<vmem>>, vector<1x1x32xf32>
    %365 = vector.shape_cast %364 : vector<1x1x32xf32> to vector<1x32xf32>
    %c1_162 = arith.constant 1 : index
    %c232_163 = arith.constant 232 : index
    %c0_164 = arith.constant 0 : index
    %366 = vector.load %arg2[%c1_162, %c232_163, %c0_164] : memref<2x408x128xf32, #tpu.memory_space<vmem>>, vector<1x1x32xf32>
    %367 = vector.shape_cast %366 : vector<1x1x32xf32> to vector<1x32xf32>
    %cst_165 = arith.constant dense<0.000000e+00> : vector<16xf32>
    %368 = vector.multi_reduction <add>, %363, %cst_165 [1] : vector<16x32xf32> to vector<16xf32>
    %369 = vector.shape_cast %368 : vector<16xf32> to vector<16x1xf32>
    %cst_166 = arith.constant 3.200000e+01 : f32
    %370 = vector.broadcast %cst_166 : f32 to vector<16x1xf32>
    %371 = arith.divf %369, %370 : vector<16x1xf32>
    %372 = vector.broadcast %371 : vector<16x1xf32> to vector<16x32xf32>
    %373 = arith.subf %363, %372 : vector<16x32xf32>
    %374 = arith.mulf %373, %373 : vector<16x32xf32>
    %cst_167 = arith.constant dense<0.000000e+00> : vector<16xf32>
    %375 = vector.multi_reduction <add>, %374, %cst_167 [1] : vector<16x32xf32> to vector<16xf32>
    %376 = vector.shape_cast %375 : vector<16xf32> to vector<16x1xf32>
    %cst_168 = arith.constant 3.200000e+01 : f32
    %377 = vector.broadcast %cst_168 : f32 to vector<16x1xf32>
    %378 = arith.divf %376, %377 : vector<16x1xf32>
    %379 = vector.broadcast %371 : vector<16x1xf32> to vector<16x32xf32>
    %380 = arith.subf %363, %379 : vector<16x32xf32>
    %cst_169 = arith.constant 9.99999996E-13 : f32
    %381 = vector.broadcast %cst_169 : f32 to vector<16x1xf32>
    %382 = arith.addf %378, %381 : vector<16x1xf32>
    %383 = math.rsqrt %382 : vector<16x1xf32>
    %384 = vector.broadcast %383 : vector<16x1xf32> to vector<16x32xf32>
    %385 = arith.mulf %380, %384 : vector<16x32xf32>
    %386 = vector.broadcast %365 : vector<1x32xf32> to vector<16x32xf32>
    %387 = arith.mulf %385, %386 : vector<16x32xf32>
    %388 = vector.broadcast %367 : vector<1x32xf32> to vector<16x32xf32>
    %389 = arith.addf %387, %388 : vector<16x32xf32>
    %c1_170 = arith.constant 1 : index
    %c240_171 = arith.constant 240 : index
    %c0_172 = arith.constant 0 : index
    %390 = vector.load %arg2[%c1_170, %c240_171, %c0_172] : memref<2x408x128xf32, #tpu.memory_space<vmem>>, vector<1x32x64xf32>
    %391 = vector.shape_cast %390 : vector<1x32x64xf32> to vector<32x64xf32>
    %cst_173 = arith.constant dense<0.000000e+00> : vector<16x64xf32>
    %392 = tpu.matmul %389, %391, %cst_173 {dimension_numbers = #tpu.dot_dimension_numbers<[1], [0], [0], [1], [0, 0, 1, 1], [], []>} : vector<16x32xf32>, vector<32x64xf32>, vector<16x64xf32> -> vector<16x64xf32>
    %c1_174 = arith.constant 1 : index
    %c272_175 = arith.constant 272 : index
    %c0_176 = arith.constant 0 : index
    %393 = vector.load %arg2[%c1_174, %c272_175, %c0_176] : memref<2x408x128xf32, #tpu.memory_space<vmem>>, vector<1x1x64xf32>
    %394 = vector.shape_cast %393 : vector<1x1x64xf32> to vector<1x64xf32>
    %395 = vector.broadcast %394 : vector<1x64xf32> to vector<16x64xf32>
    %396 = arith.addf %392, %395 : vector<16x64xf32>
    %397 = arith.mulf %396, %396 : vector<16x64xf32>
    %398 = arith.mulf %396, %397 : vector<16x64xf32>
    %cst_177 = arith.constant 4.471500e-02 : f32
    %399 = vector.broadcast %cst_177 : f32 to vector<16x64xf32>
    %400 = arith.mulf %399, %398 : vector<16x64xf32>
    %401 = arith.addf %396, %400 : vector<16x64xf32>
    %cst_178 = arith.constant 0.797884583 : f32
    %402 = vector.broadcast %cst_178 : f32 to vector<16x64xf32>
    %403 = arith.mulf %402, %401 : vector<16x64xf32>
    %404 = math.tanh %403 : vector<16x64xf32>
    %cst_179 = arith.constant 1.000000e+00 : f32
    %405 = vector.broadcast %cst_179 : f32 to vector<16x64xf32>
    %406 = arith.addf %405, %404 : vector<16x64xf32>
    %cst_180 = arith.constant 5.000000e-01 : f32
    %407 = vector.broadcast %cst_180 : f32 to vector<16x64xf32>
    %408 = arith.mulf %407, %406 : vector<16x64xf32>
    %409 = arith.mulf %396, %408 : vector<16x64xf32>
    %c1_181 = arith.constant 1 : index
    %c280_182 = arith.constant 280 : index
    %c0_183 = arith.constant 0 : index
    %410 = vector.load %arg2[%c1_181, %c280_182, %c0_183] : memref<2x408x128xf32, #tpu.memory_space<vmem>>, vector<1x64x32xf32>
    %411 = vector.shape_cast %410 : vector<1x64x32xf32> to vector<64x32xf32>
    %cst_184 = arith.constant dense<0.000000e+00> : vector<16x32xf32>
    %412 = tpu.matmul %409, %411, %cst_184 {dimension_numbers = #tpu.dot_dimension_numbers<[1], [0], [0], [1], [0, 0, 1, 1], [], []>} : vector<16x64xf32>, vector<64x32xf32>, vector<16x32xf32> -> vector<16x32xf32>
    %c1_185 = arith.constant 1 : index
    %c344_186 = arith.constant 344 : index
    %c0_187 = arith.constant 0 : index
    %413 = vector.load %arg2[%c1_185, %c344_186, %c0_187] : memref<2x408x128xf32, #tpu.memory_space<vmem>>, vector<1x1x32xf32>
    %414 = vector.shape_cast %413 : vector<1x1x32xf32> to vector<1x32xf32>
    %415 = vector.broadcast %414 : vector<1x32xf32> to vector<16x32xf32>
    %416 = arith.addf %412, %415 : vector<16x32xf32>
    %417 = arith.addf %389, %416 : vector<16x32xf32>
    %c1_188 = arith.constant 1 : index
    %c352_189 = arith.constant 352 : index
    %c0_190 = arith.constant 0 : index
    %418 = vector.load %arg2[%c1_188, %c352_189, %c0_190] : memref<2x408x128xf32, #tpu.memory_space<vmem>>, vector<1x1x32xf32>
    %419 = vector.shape_cast %418 : vector<1x1x32xf32> to vector<1x32xf32>
    %c1_191 = arith.constant 1 : index
    %c360_192 = arith.constant 360 : index
    %c0_193 = arith.constant 0 : index
    %420 = vector.load %arg2[%c1_191, %c360_192, %c0_193] : memref<2x408x128xf32, #tpu.memory_space<vmem>>, vector<1x1x32xf32>
    %421 = vector.shape_cast %420 : vector<1x1x32xf32> to vector<1x32xf32>
    %cst_194 = arith.constant dense<0.000000e+00> : vector<16xf32>
    %422 = vector.multi_reduction <add>, %417, %cst_194 [1] : vector<16x32xf32> to vector<16xf32>
    %423 = vector.shape_cast %422 : vector<16xf32> to vector<16x1xf32>
    %cst_195 = arith.constant 3.200000e+01 : f32
    %424 = vector.broadcast %cst_195 : f32 to vector<16x1xf32>
    %425 = arith.divf %423, %424 : vector<16x1xf32>
    %426 = vector.broadcast %425 : vector<16x1xf32> to vector<16x32xf32>
    %427 = arith.subf %417, %426 : vector<16x32xf32>
    %428 = arith.mulf %427, %427 : vector<16x32xf32>
    %cst_196 = arith.constant dense<0.000000e+00> : vector<16xf32>
    %429 = vector.multi_reduction <add>, %428, %cst_196 [1] : vector<16x32xf32> to vector<16xf32>
    %430 = vector.shape_cast %429 : vector<16xf32> to vector<16x1xf32>
    %cst_197 = arith.constant 3.200000e+01 : f32
    %431 = vector.broadcast %cst_197 : f32 to vector<16x1xf32>
    %432 = arith.divf %430, %431 : vector<16x1xf32>
    %433 = vector.broadcast %425 : vector<16x1xf32> to vector<16x32xf32>
    %434 = arith.subf %417, %433 : vector<16x32xf32>
    %cst_198 = arith.constant 9.99999996E-13 : f32
    %435 = vector.broadcast %cst_198 : f32 to vector<16x1xf32>
    %436 = arith.addf %432, %435 : vector<16x1xf32>
    %437 = math.rsqrt %436 : vector<16x1xf32>
    %438 = vector.broadcast %437 : vector<16x1xf32> to vector<16x32xf32>
    %439 = arith.mulf %434, %438 : vector<16x32xf32>
    %440 = vector.broadcast %419 : vector<1x32xf32> to vector<16x32xf32>
    %441 = arith.mulf %439, %440 : vector<16x32xf32>
    %442 = vector.broadcast %421 : vector<1x32xf32> to vector<16x32xf32>
    %443 = arith.addf %441, %442 : vector<16x32xf32>
    %444 = tpu.iota {dimensions = array<i32: 0>} : vector<2x16xi32>
    %445 = tpu.iota {dimensions = array<i32: 1>} : vector<2x16xi32>
    %c8_i32_199 = arith.constant 8 : i32
    %446 = vector.broadcast %c8_i32_199 : i32 to vector<2x16xi32>
    %447 = arith.muli %444, %446 : vector<2x16xi32>
    %448 = arith.cmpi eq, %445, %447 : vector<2x16xi32>
    %449 = arith.extui %448 : vector<2x16xi1> to vector<2x16xi32>
    %450 = arith.sitofp %449 : vector<2x16xi32> to vector<2x16xf32>
    %cst_200 = arith.constant dense<0.000000e+00> : vector<2x32xf32>
    %451 = tpu.matmul %450, %443, %cst_200 {dimension_numbers = #tpu.dot_dimension_numbers<[1], [0], [0], [1], [0, 0, 1, 1], [], []>} : vector<2x16xf32>, vector<16x32xf32>, vector<2x32xf32> -> vector<2x32xf32>
    %c1_201 = arith.constant 1 : index
    %c368_202 = arith.constant 368 : index
    %c0_203 = arith.constant 0 : index
    %452 = vector.load %arg2[%c1_201, %c368_202, %c0_203] : memref<2x408x128xf32, #tpu.memory_space<vmem>>, vector<1x32x32xf32>
    %453 = vector.shape_cast %452 : vector<1x32x32xf32> to vector<32x32xf32>
    %cst_204 = arith.constant dense<0.000000e+00> : vector<2x32xf32>
    %454 = tpu.matmul %451, %453, %cst_204 {dimension_numbers = #tpu.dot_dimension_numbers<[1], [0], [0], [1], [0, 0, 1, 1], [], []>} : vector<2x32xf32>, vector<32x32xf32>, vector<2x32xf32> -> vector<2x32xf32>
    %c1_205 = arith.constant 1 : index
    %c400_206 = arith.constant 400 : index
    %c0_207 = arith.constant 0 : index
    %455 = vector.load %arg2[%c1_205, %c400_206, %c0_207] : memref<2x408x128xf32, #tpu.memory_space<vmem>>, vector<1x1x32xf32>
    %456 = vector.shape_cast %455 : vector<1x1x32xf32> to vector<1x32xf32>
    %457 = vector.broadcast %456 : vector<1x32xf32> to vector<2x32xf32>
    %458 = arith.addf %454, %457 : vector<2x32xf32>
    %459 = math.tanh %458 : vector<2x32xf32>
    %cst_208 = arith.constant 0.000000e+00 : f32
    %460 = vector.broadcast %cst_208 : f32 to vector<2x64xf32>
    %461 = tpu.concatenate %229, %459, %460 in 1 : vector<2x32xf32>, vector<2x32xf32>, vector<2x64xf32> -> vector<2x128xf32>
    %c0_209 = arith.constant 0 : index
    %c0_210 = arith.constant 0 : index
    %462 = vector.load %arg3[%c0_209, %c0_210] : memref<2x128xf32, #tpu.memory_space<vmem>>, vector<2x128xf32>
    tpu.vector_store %arg3[%c0_209, %c0_210], %461 {strides = array<i32>} : memref<2x128xf32, #tpu.memory_space<vmem>>, vector<2x128xf32>,
    return
  }
}

</mosaic_0001>

<bundles_post_ra>
// kernel: protein_interaction_forward.1
= control target key start
LH: loop header
LB: loop body
LE: loop exit
PB: predicated region body
PF: predicated region fallthrough
CT: control target
= control target key end

     0   :  { %8 = vsyncpa [#allocation3], 0  ;;  %s4433_s0 = inlined_call_operand.vmem [shape: s32[2,16,1], index: 0, kind: input, shape index: {}]   ;;  %s4434_s1 = inlined_call_operand.vmem [shape: f32[2,2,1,8], index: 1, kind: input, shape index: {}]   ;;  %s4435_s2 = inlined_call_operand.hbm [shape: f32[2,408,128], index: 2, kind: input, shape index: {}]   ;;  %s4436_s3 = inlined_call_operand.hbm [shape: f32[2,128], index: 3, kind: output, shape index: {}]  }
   0x1   :  { %9 = vsyncpa [#allocation4], 0  ;;  %s4087_s12 = smov [#allocation2]   ;;  %s4039_s16 = scalar_lea.hbm %s4435_s2, 13056 }
   0x2   :  { %s19_s13 = sshll.u32 %s4087_s12, 4  ;;  %p4040_p0 = scmp.ne.s32.totalorder %s4435_s2, %s4039_s16  ;;  %s20_s13 = int_to_ptr.vmem [resolvable:$true] %s19_s13 }
   0x3   :  { %p4043_p1 = scmp.lt.u32.totalorder %s4039_s16, %s4435_s2 }
   0x5   :  { %p4045_p2 = pnand %p4043_p1, %p4040_p0 }
   0x7   :  { %4048 = shalt.err (!%p4045_p2)
}
   0x8   :  { %s4049_s21 = scalar_lea.vmem %s20_s13, 13056  ;;  %p4054_p4 = scmp.lt.s32.totalorder %s20_s13, %s20_s13 }
   0x9   :  { %p4050_p3 = scmp.ne.s32.totalorder %s20_s13, %s4049_s21  ;;  %p4055_p5 = scmp.lt.s32.totalorder %s4049_s21, %s4049_s21 }
   0xb   :  { %p4056_p6 = por %p4055_p5, %p4054_p4 }
   0xd   :  { %p4057_p7 = pnand %p4056_p6, %p4050_p3 }
   0xf   :  { %4060 = shalt.err (!%p4057_p7)
}
  0x10   :  { %s4088_s22 = smov 128   ;;  %s4089_s23 = smov 8  }
  0x11   :  { %25 = dma.hbm_to_vmem [thread:$0]  %s4435_s2, 13056, %s20_s13, [#allocation3], %s4088_s22, %s4088_s22, %s4089_s23  }
  0x12   :  { %4083 = dma.done.wait [#allocation3], 13056  }
  0x13   :  { %4084 = vsyncadd [#allocation3], 4294954240  ;;  %v4090_v0 = vmov 0   ;;  %v29_v1 = vld [vmem:[%s4433_s0] sm:$0xff]  ;;  %v46_v3 = vld [vmem:[#allocation2 + $0x8] sm:$0xff]  ;;  %vm58_vm0 = vcmask 1045504   ;;  %v31_v10 = vlaneseq }
  0x14   :  { %3969 = vset.pattern.permute.xlu0 %v4090_v0  ;;  %3970 = vset.pattern.permute.xlu1 %v4090_v0  ;;  %v45_v2 = vld [vmem:[#allocation2] sm:$0xff]  ;;  %v47_v4 = vld [vmem:[#allocation2 + $0x10] sm:$0xff]  ;;  %v48_v5 = vld [vmem:[#allocation2 + $0x18] sm:$0x3f]  ;;  %vm4091_vm1 = vmmov 1   ;;  %vm51_vm3 = vcmask 244736  }
  0x15   :  { %34 = vperm.xlu0 %3969, %v29_v1   ;;  %v30_v6 = vld [vmem:[%s4433_s0 + $0x8] sm:$0xff]  ;;  %v3801_v7 = vpack.c.bf16 %v46_v3, %v45_v2  ;;  %v3805_v8 = vpack.c.bf16 %v48_v5, %v47_v4  ;;  %vm4135_vm2 = vmpackc.low %vm58_vm0, %vm4091_vm1  ;;  %v4144_v11 = vand.u32 127, %v31_v10  ;;  %v4092_v13 = vmov 0.0   ;;  %v49_v17 = vld [vmem:[#allocation2 + $0x20] sm:$0xff]  ;;  %s4096_s13 = smov [#allocation5]  }
  0x16   :  { %v50_v19 = vld [vmem:[#allocation2 + $0x28] sm:$0xff]  ;;  %vm139_vm6 = vcmask 261120   ;;  %v179_v35 = vld [vmem:[#allocation2 + $0x40] sm:$0xff]  ;;  %v270_v39 = vld [vmem:[#allocation2 + $0x70] sm:$0xff]  ;;  %vm4093_vm7 = vmmov 0   ;;  %vm618_vm12 = vcmask 64512  }
  0x17   :  { %3802 = vmatprep.subr.bf16.mxu0 %v3801_v7  ;;  %v180_v36 = vld [vmem:[#allocation2 + $0x48] sm:$0xff]  ;;  %v181_v40 = vld [vmem:[#allocation2 + $0x50] sm:$0xff]  ;;  %v182_v41 = vld [vmem:[#allocation2 + $0x58] sm:$0xff]  ;;  %vm444_vm8 = vcmp.lt.s32.totalorder %v4144_v11, 16  ;;  %vm643_vm9 = vcmp.ge.s32.totalorder %v4144_v11, 16  ;;  %vm644_vm10 = vcmp.lt.s32.totalorder %v4144_v11, 32 }
  0x18   :  { %3804 = vmatpush3.bf16.msra.mxu0 %v3801_v7  ;;  %v269_v37 = vld [vmem:[#allocation2 + $0x68] sm:$0xff]  ;;  %v3811_v38 = vpack.c.bf16 %v180_v36, %v179_v35  ;;  %v3815_v43 = vpack.c.bf16 %v182_v41, %v181_v40  ;;  %v271_v44 = vld [vmem:[#allocation2 + $0x78] sm:$0xff]  ;;  %v272_v45 = vld [vmem:[#allocation2 + $0x80] sm:$0xff]  ;;  %v4228_v35 = vshrl.u32 %v31_v10, 7  ;;  %vm1369_vm13 = vcmask 523264   ;;  %s3271_s14 = sshll.u32 %s4096_s13, 4  ;;  %s3272_s14 = int_to_ptr.vmem [resolvable:$true] %s3271_s14 }
  0x19   :  { %37 = vperm.xlu0 %3969, %v30_v6   ;;  %3807 = vmatprep.subr.msk.bf16.mxu0 %vm4135_vm2, %v3805_v8  ;;  %v3819_v42 = vpack.c.bf16 %v270_v39, %v269_v37  ;;  %v3823_v46 = vpack.c.bf16 %v272_v45, %v271_v44  ;;  %v353_v47 = vld [vmem:[#allocation2 + $0x90] sm:$0xff]  ;;  %v354_v48 = vld [vmem:[#allocation2 + $0x98] sm:$0xff]  ;;  %v355_v0 = vld [vmem:[#allocation2 + $0xa0] sm:$0xff]  ;;  %vm1499_vm15 = vcmask 130048   ;;  %s4061_s15 = scalar_lea.vmem %s3272_s14, 32  ;;  %p4066_p9 = scmp.lt.s32.totalorder %s3272_s14, %s3272_s14 }
  0x1a   :  { %3812 = vmatprep.subr.bf16.mxu1 %v3811_v38  ;;  %v3827_v49 = vpack.c.bf16 %v354_v48, %v353_v47  ;;  %v3285_v57 = vld [vmem:[#allocation2 + $0x30] ss:$0 sm:$0xff]  ;;  %v3286_v59 = vld [vmem:[#allocation2 + $0x38] ss:$0 sm:$0xff]  ;;  %v356_v1 = vld [vmem:[#allocation2 + $0xa8] sm:$0xff]  ;;  %p4062_p8 = scmp.ne.s32.totalorder %s3272_s14, %s4061_s15  ;;  %p4067_p10 = scmp.lt.s32.totalorder %s4061_s15, %s4061_s15 }
  0x1b   :  { %3814 = vmatpush3.bf16.msra.mxu1 %v3811_v38  ;;  %v3831_v4 = vpack.c.bf16 %v356_v1, %v355_v0  ;;  %v3287_v5 = vld [vmem:[#allocation2 + $0x60] ss:$0 sm:$0xff]  ;;  %v3290_v6 = vld [vmem:[#allocation2 + $0x88] ss:$0 sm:$0xff]  ;;  %vm645_vm11 = vmand %vm643_vm9, %vm644_vm10 }
  0x1c   :  { %3810 = vmatpush3.bf16.msk.msra.mxu0 %vm4135_vm2, %v3805_v8  ;;  %3816 = vmatprep.subr.bf16.mxu1 %v3815_v43  ;;  %v4182_v8 = vsel %vm444_vm8, 1.0, %v4092_v13  ;;  %p4068_p11 = por %p4067_p10, %p4066_p9 }
  0x1d   :  { %3820 = vmatprep.subr.bf16.mxu0 %v3819_v42 }
  0x1e   :  { %p4069_p12 = pnand %p4068_p11, %p4062_p8 }
  0x1f   :  { %3818 = vmatpush3.bf16.msra.mxu1 %v3815_v43 }
  0x20   :  { %3828 = vmatprep.subr.bf16.mxu1 %v3827_v49 }
  0x94   :  { %v35_v12 = vpop.permute.xlu0 %34 }
  0x95   :  { %vm39_vm4 = vcmp.eq.s32.totalorder %v35_v12, %v4144_v11 }
  0x96   :  { %v3280_v14 = vsel %vm39_vm4, 1.0, %v4092_v13 }
  0x97   :  { %3523 = vmatprep.mubr.msk.f32.mxu0 %vm51_vm3, %v3280_v14 }
  0x98   :  { %v38_v15 = vpop.permute.xlu0 %37 }
  0x99   :  { %vm40_vm5 = vcmp.eq.s32.totalorder %v38_v15, %v4144_v11 }
  0x9a   :  { %v3281_v16 = vsel %vm40_vm5, 1.0, %v4092_v13 }
  0x9b   :  { %3524 = vmatmul.mubr.msk.f32.vlgmr.msra.gmra.mrb[0].mxu0 %vm51_vm3, %v3281_v16 }
  0x9c   :  { %3822 = vmatpush3.bf16.msra.mxu0 %v3819_v42  ;;  %v4231_v42 = vsub.s32 0, %v4228_v35 }
  0x9d   :  { %3824 = vmatprep.subr.bf16.mxu0 %v3823_v46 }
  0xa0   :  { %3826 = vmatpush3.bf16.msra.mxu0 %v3823_v46 }
  0xa1   :  { %3559 = vmatprep.subr.mxu0 %v4092_v13 }
 0x16e   :  { %v3525_v18 = vpop.f32.mrb[0].mxu0 }
 0x16f   :  { %v128_v20 = vpop.f32.mrb[1].mxu0  ;;  %v134_v22 = vadd.f32 %v3525_v18, %v50_v19 }
 0x170   :  { %v129_v21 = vadd.f32 %v128_v20, %v49_v17 }
 0x171   :  { %v143_v24 = vsel %vm139_vm6, %v134_v22, 0.0 }
 0x172   :  { %v140_v23 = vsel %vm139_vm6, %v129_v21, 0.0 }
 0x173   :  { %141 = vadd.xlane.f32.xlu1 %v140_v23  ;;  %v3293_v23 = vld [vmem:[#allocation2 + $0xb0] ss:$0 sm:$0xff] }
 0x177   :  { %144 = vadd.xlane.f32.xlu1 %v143_v24 }
 0x200   :  { %v142_v25 = vpop.xlane.xlu1 %141 }
 0x201   :  { %v147_v26 = vmul.f32 0.03125, %v142_v25 }
 0x203   :  { %v149_v27 = vsub.f32 %v129_v21, %v147_v26 }
 0x204   :  { %v145_v28 = vpop.xlane.xlu1 %144 }
 0x205   :  { %v148_v29 = vmul.f32 0.03125, %v145_v28  ;;  %v151_v30 = vmul.f32 %v149_v27, %v149_v27 }
 0x207   :  { %v150_v31 = vsub.f32 %v134_v22, %v148_v29  ;;  %v153_v32 = vsel %vm139_vm6, %v151_v30, 0.0  ;;  %v4190_v22 = vsel %vm645_vm11, 1.0, %v4092_v13 }
 0x208   :  { %154 = vadd.xlane.f32.xlu0 %v153_v32  ;;  %v437_v32 = vld [vmem:[%s4434_s1] sm:$0x1] }
 0x209   :  { %v152_v33 = vmul.f32 %v150_v31, %v150_v31 }
 0x20b   :  { %v156_v34 = vsel %vm139_vm6, %v152_v33, 0.0  ;;  %v438_v33 = vld [vmem:[%s4434_s1 + $0x1] sm:$0x1] }
 0x20c   :  { %157 = vadd.xlane.f32.xlu1 %v156_v34  ;;  %v439_v34 = vsub.f32 1.0, %v437_v32  ;;  %v440_v37 = vsub.f32 1.0, %v438_v33 }
 0x20e   :  { %v441_v41 = vmul.f32 -1e+09, %v439_v34  ;;  %v442_v44 = vmul.f32 -1e+09, %v440_v37 }
 0x295   :  { %v155_v50 = vpop.xlane.xlu0 %154 }
 0x296   :  { %v159_v51 = vmul.f32 0.03125, %v155_v50  ;;  %v609_v50 = vrot.slane %v441_v41, %v4231_v42 }
 0x298   :  { %v161_v52 = vadd.f32 1e-12, %v159_v51  ;;  %v613_v51 = vrot.slane %v442_v44, %v4231_v42 }
 0x299   :  { %v158_v53 = vpop.xlane.xlu1 %157 }
 0x29a   :  { %3971 = vrsqrt.f32 %v161_v52  ;;  %v160_v54 = vmul.f32 0.03125, %v158_v53 }
 0x29c   :  { %v162_v55 = vadd.f32 1e-12, %v160_v54 }
 0x29e   :  { %3973 = vrsqrt.f32 %v162_v55 }
 0x2a4   :  { %v3972_v56 = vpop.eup %3971 }
 0x2a5   :  { %v165_v58 = vmul.f32 %v3972_v56, %v149_v27 }
 0x2a7   :  { %v171_v60 = vmul.f32 %v3285_v57, %v165_v58 }
 0x2a8   :  { %v3974_v61 = vpop.eup %3973 }
 0x2a9   :  { %v4157_v62 = vadd.f32 %v3286_v59, %v171_v60  ;;  %v166_v63 = vmul.f32 %v3974_v61, %v150_v31 }
 0x2ab   :  { %3534 = vmatprep.mubr.msk.f32.mxu1 %vm139_vm6, %v4157_v62  ;;  %3545 = vmatprep.mubr.msk.f32.mxu0 %vm139_vm6, %v4157_v62  ;;  %v172_v2 = vmul.f32 %v3285_v57, %v166_v63 }
 0x2ad   :  { %v4163_v3 = vadd.f32 %v3286_v59, %v172_v2 }
 0x2af   :  { %3535 = vmatmul.mubr.msk.f32.vlgmr.msra.gmra.mrb[0].mxu1 %vm139_vm6, %v4163_v3  ;;  %3546 = vmatmul.mubr.msk.f32.vlgmr.msra.gmra.mrb[2].mxu0 %vm139_vm6, %v4163_v3 }
 0x2b0   :  { %3830 = vmatpush3.bf16.msra.mxu1 %v3827_v49  ;;  %3556 = vmatprep.mubr.msk.f32.mxu1 %vm139_vm6, %v4157_v62 }
 0x2b1   :  { %3832 = vmatprep.subr.bf16.mxu1 %v3831_v4  ;;  %3561 = vmatprep.mubr.msk.f32.mxu0 %vm4093_vm7, %v4092_v13 }
 0x2b4   :  { %3834 = vmatpush3.bf16.msra.mxu1 %v3831_v4 }
 0x2b5   :  { %3564 = vmatprep.subr.mxu1 %v4092_v13 }
 0x2b7   :  { %3557 = vmatmul.mubr.msk.f32.vlgmr.msra.gmra.mrb[2].mxu1 %vm139_vm6, %v4163_v3 }
 0x2b8   :  { %3566 = vmatprep.mubr.msk.f32.mxu1 %vm4093_vm7, %v4092_v13 }
 0x382   :  { %v3536_v7 = vpop.f32.mrb[0].mxu1  ;;  %v3547_v12 = vpop.f32.mrb[2].mxu0 }
 0x383   :  { %v266_v14 = vadd.f32 %v3536_v7, %v3287_v5  ;;  %v350_v15 = vadd.f32 %v3547_v12, %v3290_v6  ;;  %v260_v16 = vpop.f32.mrb[1].mxu1  ;;  %v344_v17 = vpop.f32.mrb[3].mxu0 }
 0x384   :  { %v261_v18 = vadd.f32 %v3287_v5, %v260_v16  ;;  %v345_v19 = vadd.f32 %v3290_v6, %v344_v17 }
 0x385   :  { %v449_v20 = vmul.f32 %v4182_v8, %v266_v14  ;;  %3565 = vmatpush3.xpose.msk.msra.mxu1 %vm139_vm6, %v350_v15  ;;  %v649_v24 = vmul.f32 %v4190_v22, %v266_v14 }
 0x386   :  { %v448_v21 = vmul.f32 %v4182_v8, %v261_v18  ;;  %3560 = vmatpush3.xpose.msk.msra.mxu0 %vm139_vm6, %v345_v19  ;;  %3574 = vmatprep.subr.mxu1 %v4092_v13  ;;  %v648_v26 = vmul.f32 %v4190_v22, %v261_v18 }
 0x387   :  { %3569 = vmatprep.subr.mxu0 %v4092_v13 }
 0x388   :  { %3567 = vmatmul.mubr.msk.f32.vlgmr.msra.gmra.mrb[4].mxu1 %vm139_vm6, %v449_v20 }
 0x389   :  { %3562 = vmatmul.mubr.msk.f32.vlgmr.msra.gmra.mrb[4].mxu0 %vm139_vm6, %v448_v21  ;;  %3575 = vmatpush3.xpose.msk.msra.mxu1 %vm139_vm6, %v350_v15 }
 0x38a   :  { %v3558_v25 = vpop.f32.mrb[2].mxu1  ;;  %3570 = vmatpush3.xpose.msk.msra.mxu0 %vm139_vm6, %v345_v19  ;;  %3576 = vmatprep.mubr.msk.f32.mxu1 %vm4093_vm7, %v4092_v13 }
 0x38b   :  { %v4201_v27 = vadd.f32 %v3558_v25, %v3293_v23  ;;  %v428_v28 = vpop.f32.mrb[3].mxu1  ;;  %3571 = vmatprep.mubr.msk.f32.mxu0 %vm4093_vm7, %v4092_v13  ;;  %3584 = vmatprep.subr.mxu1 %v4092_v13 }
 0x38c   :  { %v4206_v29 = vadd.f32 %v3293_v23, %v428_v28  ;;  %3577 = vmatmul.mubr.msk.f32.vlgmr.msra.gmra.mrb[6].mxu1 %vm139_vm6, %v649_v24  ;;  %3579 = vmatprep.subr.mxu0 %v4092_v13 }
 0x38d   :  { %v823_v30 = vmul.f32 %v4190_v22, %v4201_v27  ;;  %3572 = vmatmul.mubr.msk.f32.vlgmr.msra.gmra.mrb[6].mxu0 %vm139_vm6, %v648_v26  ;;  %3586 = vmatprep.mubr.msk.f32.mxu1 %vm4093_vm7, %v4092_v13 }
 0x38e   :  { %v822_v31 = vmul.f32 %v4190_v22, %v4206_v29  ;;  %3581 = vmatprep.mubr.msk.f32.mxu0 %vm4093_vm7, %v4092_v13  ;;  %v641_v37 = vmul.f32 %v4182_v8, %v4206_v29 }
 0x38f   :  { %3585 = vmatpush3.msra.mxu1 %v823_v30  ;;  %v1116_v30 = vld [vmem:[#allocation2 + $0xb8] sm:$0xff] }
 0x390   :  { %3580 = vmatpush3.msra.mxu0 %v822_v31  ;;  %3594 = vmatprep.subr.mxu1 %v4092_v13  ;;  %v1117_v31 = vld [vmem:[#allocation2 + $0xc0] sm:$0xff] }
 0x391   :  { %3589 = vmatprep.subr.mxu0 %v4092_v13 }
 0x45b   :  { %v598_v36 = vpop.f32.mrb[4].mxu1 }
 0x45c   :  { %v522_v38 = vpop.f32.mrb[4].mxu0  ;;  %v3568_v39 = vpop.f32.mrb[5].mxu1  ;;  %v603_v55 = vmul.f32 0.25, %v598_v36  ;;  %v3835_v36 = vpack.c.bf16 %v1117_v31, %v1116_v30  ;;  %v3314_v30 = vld [vmem:[#allocation2 + $0xe8] ss:$0 sm:$0xff] }
 0x45d   :  { %v3563_v40 = vpop.f32.mrb[5].mxu0  ;;  %v602_v52 = vmul.f32 0.25, %v522_v38 }
 0x45e   :  { %v617_v59 = vadd.f32 %v613_v51, %v603_v55  ;;  %v642_v40 = vmul.f32 %v4182_v8, %v4201_v27 }
 0x45f   :  { %v792_v43 = vpop.f32.mrb[6].mxu1  ;;  %v616_v57 = vadd.f32 %v609_v50, %v602_v52 }
 0x460   :  { %v719_v45 = vpop.f32.mrb[6].mxu0  ;;  %v3578_v46 = vpop.f32.mrb[7].mxu1  ;;  %v797_v47 = vmul.f32 0.25, %v792_v43  ;;  %v622_v60 = vsel %vm618_vm12, %v617_v59, -inf }
 0x461   :  { %v796_v48 = vmul.f32 0.25, %v719_v45  ;;  %v3573_v49 = vpop.f32.mrb[7].mxu0  ;;  %v619_v58 = vsel %vm618_vm12, %v616_v57, -inf  ;;  %v1118_v45 = vld [vmem:[#allocation2 + $0xc8] sm:$0xff]  ;;  %v1119_v46 = vld [vmem:[#allocation2 + $0xd0] sm:$0xff] }
 0x462   :  { %v799_v54 = vadd.f32 %v797_v47, %v613_v51  ;;  %v3839_v47 = vpack.c.bf16 %v1119_v46, %v1118_v45  ;;  %v1362_v45 = vld [vmem:[#allocation2 + $0x148] sm:$0xff]  ;;  %v1363_v46 = vld [vmem:[#allocation2 + $0x150] sm:$0xff] }
 0x463   :  { %v798_v10 = vadd.f32 %v796_v48, %v609_v50 }
 0x464   :  { %v803_v56 = vsel %vm618_vm12, %v799_v54, -inf }
 0x465   :  { %v800_v53 = vsel %vm618_vm12, %v798_v10, -inf }
 0x466   :  { %801 = vmax.xlane.f32.xlu1 %v800_v53 }
 0x46a   :  { %804 = vmax.xlane.f32.xlu1 %v803_v56 }
 0x46e   :  { %620 = vmax.xlane.f32.xlu1 %v619_v58 }
 0x472   :  { %623 = vmax.xlane.f32.xlu1 %v622_v60 }
 0x4f3   :  { %v802_v61 = vpop.xlane.xlu1 %801 }
 0x4f4   :  { %v806_v63 = vsub.f32 %v798_v10, %v802_v61  ;;  %v3310_v10 = vld [vmem:[#allocation2 + $0xd8] ss:$0 sm:$0xff] }
 0x4f6   :  { %v808_v0 = vmul.f32 1.442695, %v806_v63 }
 0x4f7   :  { %v805_v1 = vpop.xlane.xlu1 %804 }
 0x4f8   :  { %3975 = vpow2.f32 %v808_v0  ;;  %v807_v2 = vsub.f32 %v799_v54, %v805_v1 }
 0x4fa   :  { %v810_v4 = vmul.f32 1.442695, %v807_v2 }
 0x4fb   :  { %v621_v5 = vpop.xlane.xlu1 %620 }
 0x4fc   :  { %3977 = vpow2.f32 %v810_v4  ;;  %v625_v6 = vsub.f32 %v616_v57, %v621_v5 }
 0x4fe   :  { %v627_v7 = vmul.f32 1.442695, %v625_v6  ;;  %v1249_v6 = vld [vmem:[#allocation2 + $0xf8] sm:$0xff] }
 0x4ff   :  { %v624_v12 = vpop.xlane.xlu1 %623 }
 0x500   :  { %3979 = vpow2.f32 %v627_v7  ;;  %v626_v14 = vsub.f32 %v617_v59, %v624_v12  ;;  %v1250_v12 = vld [vmem:[#allocation2 + $0x100] sm:$0xff] }
 0x502   :  { %v3976_v15 = vpop.eup %3975  ;;  %v629_v16 = vmul.f32 1.442695, %v626_v14  ;;  %v1251_v14 = vld [vmem:[#allocation2 + $0x108] sm:$0xff] }
 0x503   :  { %v812_v17 = vsel %vm618_vm12, %v3976_v15, 0.0 }
 0x504   :  { %3981 = vpow2.f32 %v629_v16  ;;  %813 = vadd.xlane.f32.xlu1 %v812_v17 }
 0x506   :  { %v3978_v18 = vpop.eup %3977 }
 0x507   :  { %v815_v19 = vsel %vm618_vm12, %v3978_v18, 0.0 }
 0x508   :  { %816 = vadd.xlane.f32.xlu1 %v815_v19 }
 0x50a   :  { %v3980_v20 = vpop.eup %3979 }
 0x50b   :  { %v631_v21 = vsel %vm618_vm12, %v3980_v20, 0.0 }
 0x50c   :  { %632 = vadd.xlane.f32.xlu1 %v631_v21 }
 0x50e   :  { %v3982_v23 = vpop.eup %3981 }
 0x50f   :  { %v634_v24 = vsel %vm618_vm12, %v3982_v23, 0.0 }
 0x510   :  { %635 = vadd.xlane.f32.xlu0 %v634_v24  ;;  %v3313_v24 = vld [vmem:[#allocation2 + $0xe0] ss:$0 sm:$0xff] }
 0x591   :  { %v814_v25 = vpop.xlane.xlu1 %813 }
 0x592   :  { %3983 = vrcp.f32 %v814_v25 }
 0x595   :  { %v817_v26 = vpop.xlane.xlu1 %816 }
 0x596   :  { %3985 = vrcp.f32 %v817_v26 }
 0x599   :  { %v633_v28 = vpop.xlane.xlu1 %632 }
 0x59a   :  { %3987 = vrcp.f32 %v633_v28 }
 0x59c   :  { %v3984_v32 = vpop.eup %3983 }
 0x59d   :  { %v820_v33 = vmul.f32 %v3984_v32, %v3976_v15  ;;  %v636_v34 = vpop.xlane.xlu0 %635  ;;  %v3847_v15 = vpack.c.bf16 %v1251_v14, %v1250_v12 }
 0x59e   :  { %3989 = vrcp.f32 %v636_v34 }
 0x59f   :  { %3582 = vmatmul.mubr.msk.f32.vlgmr.msra.gmra.mrb[8].mxu0 %vm618_vm12, %v820_v33 }
 0x5a0   :  { %v3986_v38 = vpop.eup %3985  ;;  %3590 = vmatpush3.msra.mxu0 %v641_v37  ;;  %3591 = vmatprep.mubr.msk.f32.mxu0 %vm4093_vm7, %v4092_v13  ;;  %v1357_v37 = vld [vmem:[#allocation2 + $0x120] sm:$0xff] }
 0x5a1   :  { %v821_v39 = vmul.f32 %v3986_v38, %v3978_v18  ;;  %3836 = vmatprep.subr.bf16.mxu0 %v3835_v36 }
 0x5a3   :  { %3587 = vmatmul.mubr.msk.f32.vlgmr.msra.gmra.mrb[8].mxu1 %vm618_vm12, %v821_v39  ;;  %v1358_v39 = vld [vmem:[#allocation2 + $0x128] sm:$0xff] }
 0x5a4   :  { %v3988_v41 = vpop.eup %3987  ;;  %3595 = vmatpush3.msra.mxu1 %v642_v40  ;;  %3596 = vmatprep.mubr.msk.f32.mxu1 %vm4093_vm7, %v4092_v13  ;;  %v1359_v40 = vld [vmem:[#allocation2 + $0x130] sm:$0xff] }
 0x5a5   :  { %v639_v29 = vmul.f32 %v3988_v41, %v3980_v20  ;;  %v3855_v41 = vpack.c.bf16 %v1359_v40, %v1358_v39 }
 0x5a7   :  { %3592 = vmatmul.mubr.msk.f32.vlgmr.msra.gmra.mrb[8].mxu0 %vm618_vm12, %v639_v29  ;;  %v1360_v29 = vld [vmem:[#allocation2 + $0x138] sm:$0xff] }
 0x5a8   :  { %v3990_v43 = vpop.eup %3989  ;;  %3838 = vmatpush3.bf16.msra.mxu0 %v3835_v36  ;;  %v1356_v36 = vld [vmem:[#allocation2 + $0x118] sm:$0xff] }
 0x5a9   :  { %v640_v44 = vmul.f32 %v3990_v43, %v3982_v23  ;;  %3840 = vmatprep.subr.bf16.mxu0 %v3839_v47  ;;  %v3851_v38 = vpack.c.bf16 %v1357_v37, %v1356_v36  ;;  %v1361_v43 = vld [vmem:[#allocation2 + $0x140] sm:$0xff] }
 0x5ab   :  { %3597 = vmatmul.mubr.msk.f32.vlgmr.msra.gmra.mrb[8].mxu1 %vm618_vm12, %v640_v44  ;;  %v3859_v44 = vpack.c.bf16 %v1361_v43, %v1360_v29  ;;  %v3321_v43 = vld [vmem:[#allocation2 + $0x160] ss:$0 sm:$0xff] }
 0x5ac   :  { %3842 = vmatpush3.bf16.msra.mxu0 %v3839_v47  ;;  %v3863_v47 = vpack.c.bf16 %v1363_v46, %v1362_v45 }
 0x5ad   :  { %3852 = vmatprep.subr.bf16.mxu0 %v3851_v38 }
 0x67a   :  { %v1039_v27 = vpop.f32.mrb[8].mxu0 }
 0x67b   :  { %v3593_v48 = vpop.f32.mrb[9].mxu0  ;;  %3607 = vmatprep.mubr.msk.f32.mxu0 %vm139_vm6, %v1039_v27  ;;  %v3315_v27 = vld [vmem:[#allocation2 + $0x110] ss:$0 sm:$0xff] }
 0x67e   :  { %v1112_v49 = vpop.f32.mrb[8].mxu1 }
 0x67f   :  { %v3598_v50 = vpop.f32.mrb[9].mxu1  ;;  %3608 = vmatmul.mubr.msk.f32.vlgmr.msra.gmra.mrb[10].mxu0 %vm139_vm6, %v1112_v49 }
 0x680   :  { %3854 = vmatpush3.bf16.msra.mxu0 %v3851_v38 }
 0x681   :  { %3856 = vmatprep.subr.bf16.mxu0 %v3855_v41 }
 0x684   :  { %3858 = vmatpush3.bf16.msra.mxu0 %v3855_v41 }
 0x685   :  { %3860 = vmatprep.subr.bf16.mxu0 %v3859_v44 }
 0x688   :  { %3862 = vmatpush3.bf16.msra.mxu0 %v3859_v44 }
 0x689   :  { %3864 = vmatprep.subr.bf16.mxu0 %v3863_v47 }
 0x68c   :  { %3866 = vmatpush3.bf16.msra.mxu0 %v3863_v47  ;;  %v3322_v47 = vld [vmem:[#allocation2 + $0x168] ss:$0 sm:$0xff] }
 0x752   :  { %v3609_v51 = vpop.f32.mrb[10].mxu0 }
 0x753   :  { %v1203_v52 = vadd.f32 %v3609_v51, %v3310_v10  ;;  %v1197_v53 = vpop.f32.mrb[11].mxu0 }
 0x754   :  { %v1198_v54 = vadd.f32 %v3310_v10, %v1197_v53 }
 0x755   :  { %v1207_v55 = vadd.f32 %v1203_v52, %v4163_v3 }
 0x756   :  { %v1206_v56 = vadd.f32 %v1198_v54, %v4157_v62  ;;  %v1248_v62 = vld [vmem:[#allocation2 + $0xf0] sm:$0xff] }
 0x757   :  { %v1213_v57 = vsel %vm139_vm6, %v1207_v55, 0.0  ;;  %v3843_v7 = vpack.c.bf16 %v1249_v6, %v1248_v62  ;;  %v3318_v62 = vld [vmem:[#allocation2 + $0x158] ss:$0 sm:$0xff] }
 0x758   :  { %1214 = vadd.xlane.f32.xlu0 %v1213_v57  ;;  %v1210_v58 = vsel %vm139_vm6, %v1206_v56, 0.0 }
 0x759   :  { %1211 = vadd.xlane.f32.xlu1 %v1210_v58  ;;  %3844 = vmatprep.subr.bf16.mxu1 %v3843_v7 }
 0x75a   :  { %3846 = vmatpush3.bf16.msra.mxu1 %v3843_v7 }
 0x75b   :  { %3848 = vmatprep.subr.bf16.mxu1 %v3847_v15 }
 0x75e   :  { %3850 = vmatpush3.bf16.msra.mxu1 %v3847_v15 }
 0x7e5   :  { %v1215_v59 = vpop.xlane.xlu0 %1214 }
 0x7e6   :  { %v1217_v60 = vmul.f32 0.03125, %v1215_v59  ;;  %v1212_v61 = vpop.xlane.xlu1 %1211 }
 0x7e7   :  { %v1216_v63 = vmul.f32 0.03125, %v1212_v61 }
 0x7e8   :  { %v1219_v0 = vsub.f32 %v1207_v55, %v1217_v60 }
 0x7e9   :  { %v1218_v1 = vsub.f32 %v1206_v56, %v1216_v63 }
 0x7ea   :  { %v1221_v2 = vmul.f32 %v1219_v0, %v1219_v0 }
 0x7eb   :  { %v1220_v4 = vmul.f32 %v1218_v1, %v1218_v1 }
 0x7ec   :  { %v1225_v5 = vsel %vm139_vm6, %v1221_v2, 0.0 }
 0x7ed   :  { %1226 = vadd.xlane.f32.xlu0 %v1225_v5  ;;  %v1222_v3 = vsel %vm139_vm6, %v1220_v4, 0.0 }
 0x7ee   :  { %1223 = vadd.xlane.f32.xlu1 %v1222_v3 }
 0x87a   :  { %v1227_v16 = vpop.xlane.xlu0 %1226 }
 0x87b   :  { %v1229_v17 = vmul.f32 0.03125, %v1227_v16  ;;  %v1224_v18 = vpop.xlane.xlu1 %1223 }
 0x87c   :  { %v1228_v19 = vmul.f32 0.03125, %v1224_v18 }
 0x87d   :  { %v1231_v20 = vadd.f32 1e-12, %v1229_v17 }
 0x87e   :  { %v1230_v21 = vadd.f32 1e-12, %v1228_v19 }
 0x87f   :  { %3991 = vrsqrt.f32 %v1231_v20 }
 0x880   :  { %3993 = vrsqrt.f32 %v1230_v21 }
 0x889   :  { %v3992_v23 = vpop.eup %3991 }
 0x88a   :  { %v3994_v25 = vpop.eup %3993  ;;  %v1235_v26 = vmul.f32 %v3992_v23, %v1219_v0 }
 0x88b   :  { %v1234_v28 = vmul.f32 %v3994_v25, %v1218_v1 }
 0x88c   :  { %v1241_v31 = vmul.f32 %v3313_v24, %v1235_v26 }
 0x88d   :  { %v1240_v32 = vmul.f32 %v3313_v24, %v1234_v28 }
 0x88e   :  { %v1247_v34 = vadd.f32 %v3314_v30, %v1241_v31 }
 0x88f   :  { %v1246_v33 = vadd.f32 %v3314_v30, %v1240_v32  ;;  %v3328_v32 = vld [vmem:[%s4433_s0 + $0x18] sm:$0xff] }
 0x891   :  { %3618 = vmatprep.mubr.msk.f32.mxu1 %vm139_vm6, %v1246_v33 }
 0x892   :  { %3619 = vmatmul.mubr.msk.f32.vlgmr.msra.gmra.mrb[10].mxu1 %vm139_vm6, %v1247_v34 }
 0x893   :  { %3644 = vmatprep.mubr.msk.f32.mxu1 %vm4093_vm7, %v4092_v13 }
 0x965   :  { %v3620_v48 = vpop.f32.mrb[10].mxu1 }
 0x966   :  { %v1335_v49 = vadd.f32 %v3620_v48, %v3315_v27  ;;  %v1329_v50 = vpop.f32.mrb[11].mxu1  ;;  %v1495_v48 = vmul.u32 8, %v4228_v35 }
 0x967   :  { %v1330_v10 = vadd.f32 %v3315_v27, %v1329_v50 }
 0x968   :  { %v1339_v51 = vmul.f32 %v1335_v49, %v1335_v49  ;;  %vm1496_vm14 = vcmp.eq.s32.totalorder %v4144_v11, %v1495_v48 }
 0x969   :  { %v1338_v52 = vmul.f32 %v1330_v10, %v1330_v10 }
 0x96a   :  { %v1341_v53 = vmul.f32 %v1339_v51, %v1335_v49  ;;  %v1573_v51 = vld [vmem:[#allocation2 + $0x170] sm:$0xff] }
 0x96b   :  { %v1340_v54 = vmul.f32 %v1338_v52, %v1330_v10  ;;  %v1574_v52 = vld [vmem:[#allocation2 + $0x178] sm:$0xff] }
 0x96c   :  { %v1343_v55 = vmul.f32 0.044715, %v1341_v53 }
 0x96d   :  { %v1342_v56 = vmul.f32 0.044715, %v1340_v54  ;;  %v4283_v54 = vsel %vm1496_vm14, 1.0, %v4092_v13 }
 0x96e   :  { %v1345_v57 = vadd.f32 %v1343_v55, %v1335_v49  ;;  %v3871_v55 = vpack.c.bf16 %v1574_v52, %v1573_v51 }
 0x96f   :  { %v1344_v58 = vadd.f32 %v1342_v56, %v1330_v10  ;;  %v1575_v56 = vld [vmem:[#allocation2 + $0x180] sm:$0xff] }
 0x970   :  { %v1347_v59 = vmul.f32 0.7978846, %v1345_v57  ;;  %v1576_v57 = vld [vmem:[#allocation2 + $0x188] sm:$0xff] }
 0x971   :  { %v1346_v60 = vmul.f32 0.7978846, %v1344_v58  ;;  %v3874_v35 = vpack.c.bf16 %v1576_v57, %v1575_v56  ;;  %v1672_v58 = vld [vmem:[#allocation2 + $0x198] sm:$0xff] }
 0x972   :  { %3995 = vtanh.f32 %v1347_v59  ;;  %v1673_v59 = vld [vmem:[#allocation2 + $0x1a0] sm:$0xff] }
 0x973   :  { %3997 = vtanh.f32 %v1346_v60  ;;  %v3876_v60 = vpack.c.bf16 %v1673_v59, %v1672_v58  ;;  %v3335_v58 = vld [vmem:[#allocation2 + $0x1d0] ss:$0 sm:$0xff] }
 0x97c   :  { %v3996_v61 = vpop.eup %3995 }
 0x97d   :  { %v3998_v63 = vpop.eup %3997  ;;  %v1351_v0 = vadd.f32 1.0, %v3996_v61 }
 0x97e   :  { %v1350_v1 = vadd.f32 1.0, %v3998_v63  ;;  %v1674_v63 = vld [vmem:[#allocation2 + $0x1a8] sm:$0xff] }
 0x97f   :  { %v1353_v2 = vmul.f32 0.5, %v1351_v0  ;;  %v1675_v0 = vld [vmem:[#allocation2 + $0x1b0] sm:$0x3f] }
 0x980   :  { %v1352_v4 = vmul.f32 0.5, %v1350_v1  ;;  %v3880_v1 = vpack.c.bf16 %v1675_v0, %v1674_v63  ;;  %v1979_v63 = vld [vmem:[#allocation2 + $0x240] sm:$0xff] }
 0x981   :  { %v1355_v3 = vmul.f32 %v1353_v2, %v1335_v49 }
 0x982   :  { %v1354_v5 = vmul.f32 %v1352_v4, %v1330_v10 }
 0x984   :  { %3637 = vmatprep.mubr.msk.f32.mxu0 %vm1369_vm13, %v1354_v5 }
 0x985   :  { %3638 = vmatmul.mubr.msk.f32.vlgmr.msra.gmra.mrb[12].mxu0 %vm1369_vm13, %v1355_v3 }
 0xa58   :  { %v3639_v6 = vpop.f32.mrb[12].mxu0 }
 0xa59   :  { %v1448_v7 = vadd.f32 %v3639_v6, %v3318_v62  ;;  %v1442_v12 = vpop.f32.mrb[13].mxu0 }
 0xa5a   :  { %v1443_v14 = vadd.f32 %v3318_v62, %v1442_v12  ;;  %v1677_v12 = vld [vmem:[#allocation2 + $0x1c0] sm:$0xff] }
 0xa5b   :  { %v1452_v15 = vadd.f32 %v1448_v7, %v1247_v34  ;;  %v3327_v34 = vld [vmem:[%s4433_s0 + $0x10] sm:$0xff] }
 0xa5c   :  { %v1451_v16 = vadd.f32 %v1443_v14, %v1246_v33  ;;  %v4094_v33 = vmov 0.0|0.0   ;;  %v1676_v14 = vld [vmem:[#allocation2 + $0x1b8] sm:$0xff] }
 0xa5d   :  { %v1458_v17 = vsel %vm139_vm6, %v1452_v15, 0.0  ;;  %3867 = vmatprep.subr.bf16.mxu1 %v4094_v33 }
 0xa5e   :  { %1459 = vadd.xlane.f32.xlu0 %v1458_v17  ;;  %v1455_v18 = vsel %vm139_vm6, %v1451_v16, 0.0 }
 0xa5f   :  { %1456 = vadd.xlane.f32.xlu1 %v1455_v18 }
 0xaeb   :  { %v1460_v19 = vpop.xlane.xlu0 %1459 }
 0xaec   :  { %v1462_v20 = vmul.f32 0.03125, %v1460_v19  ;;  %v1457_v21 = vpop.xlane.xlu1 %1456 }
 0xaed   :  { %v1461_v23 = vmul.f32 0.03125, %v1457_v21 }
 0xaee   :  { %v1464_v24 = vsub.f32 %v1452_v15, %v1462_v20 }
 0xaef   :  { %v1463_v25 = vsub.f32 %v1451_v16, %v1461_v23 }
 0xaf0   :  { %v1466_v26 = vmul.f32 %v1464_v24, %v1464_v24 }
 0xaf1   :  { %v1465_v28 = vmul.f32 %v1463_v25, %v1463_v25 }
 0xaf2   :  { %v1470_v30 = vsel %vm139_vm6, %v1466_v26, 0.0 }
 0xaf3   :  { %1471 = vadd.xlane.f32.xlu0 %v1470_v30  ;;  %v1467_v31 = vsel %vm139_vm6, %v1465_v28, 0.0 }
 0xaf4   :  { %1468 = vadd.xlane.f32.xlu1 %v1467_v31 }
 0xb05   :  { %1660 = vperm.xlu1 %3970, %v3327_v34   ;;  %v1803_v34 = vld [vmem:[#allocation2 + $0x1e0] sm:$0xff] }
 0xb09   :  { %1663 = vperm.xlu0 %3969, %v3328_v32   ;;  %v1802_v32 = vld [vmem:[#allocation2 + $0x1d8] sm:$0xff] }
 0xb80   :  { %v1472_v36 = vpop.xlane.xlu0 %1471 }
 0xb81   :  { %v1474_v37 = vmul.f32 0.03125, %v1472_v36  ;;  %v1469_v38 = vpop.xlane.xlu1 %1468  ;;  %v3886_v36 = vpack.c.bf16 %v1803_v34, %v1802_v32 }
 0xb82   :  { %v1473_v39 = vmul.f32 0.03125, %v1469_v38  ;;  %v1893_v38 = vld [vmem:[#allocation2 + $0x208] sm:$0xff] }
 0xb83   :  { %v1476_v40 = vadd.f32 1e-12, %v1474_v37  ;;  %v1892_v37 = vld [vmem:[#allocation2 + $0x200] sm:$0xff]  ;;  %3887 = vmatprep.subr.bf16.mxu0 %v3886_v36 }
 0xb84   :  { %v1475_v41 = vadd.f32 1e-12, %v1473_v39  ;;  %v3894_v39 = vpack.c.bf16 %v1893_v38, %v1892_v37  ;;  %3889 = vmatpush3.bf16.msra.mxu0 %v3886_v36 }
 0xb85   :  { %3999 = vrsqrt.f32 %v1476_v40  ;;  %v1661_v61 = vpop.permute.xlu1 %1660  ;;  %v1804_v40 = vld [vmem:[#allocation2 + $0x1e8] sm:$0xff] }
 0xb86   :  { %4001 = vrsqrt.f32 %v1475_v41  ;;  %vm1665_vm0 = vcmp.eq.s32.totalorder %v1661_v61, %v4144_v11  ;;  %v1805_v41 = vld [vmem:[#allocation2 + $0x1f0] sm:$0xff]  ;;  %v1978_v61 = vld [vmem:[#allocation2 + $0x238] sm:$0xff] }
 0xb87   :  { %v3329_v2 = vsel %vm1665_vm0, 1.0, %v4092_v13 }
 0xb88   :  { %v1664_v3 = vpop.permute.xlu0 %1663 }
 0xb89   :  { %vm1666_vm1 = vcmp.eq.s32.totalorder %v1664_v3, %v4144_v11 }
 0xb8a   :  { %v3330_v62 = vsel %vm1666_vm1, 1.0, %v4092_v13 }
 0xb8f   :  { %v4000_v29 = vpop.eup %3999 }
 0xb90   :  { %v4002_v44 = vpop.eup %4001  ;;  %v1480_v45 = vmul.f32 %v4000_v29, %v1464_v24  ;;  %v1894_v29 = vld [vmem:[#allocation2 + $0x210] sm:$0xff] }
 0xb91   :  { %v1479_v46 = vmul.f32 %v4002_v44, %v1463_v25  ;;  %v1895_v44 = vld [vmem:[#allocation2 + $0x218] sm:$0xff] }
 0xb92   :  { %v1486_v27 = vmul.f32 %v3321_v43, %v1480_v45  ;;  %v3898_v45 = vpack.c.bf16 %v1895_v44, %v1894_v29 }
 0xb93   :  { %v1485_v49 = vmul.f32 %v3321_v43, %v1479_v46  ;;  %v3890_v43 = vpack.c.bf16 %v1805_v41, %v1804_v40  ;;  %v1976_v46 = vld [vmem:[#allocation2 + $0x228] sm:$0xff] }
 0xb94   :  { %v1492_v50 = vadd.f32 %v3322_v47, %v1486_v27 }
 0xb95   :  { %v1491_v10 = vadd.f32 %v3322_v47, %v1485_v49  ;;  %3891 = vmatprep.subr.bf16.mxu0 %v3890_v43  ;;  %v1977_v47 = vld [vmem:[#allocation2 + $0x230] sm:$0xff] }
 0xb96   :  { %3893 = vmatpush3.bf16.msra.mxu0 %v3890_v43  ;;  %v3902_v27 = vpack.c.bf16 %v1977_v47, %v1976_v46 }
 0xb97   :  { %v3868_v53 = vpack.c.bf16 %v1492_v50, %v1491_v10 }
 0xb98   :  { %3903 = vmatprep.subr.bf16.mxu0 %v3902_v27 }
 0xb99   :  { %3869 = vmatpush3.bf16.msra.mxu1 %v3868_v53 }
 0xb9a   :  { %3870 = vmatprep.subr.bf16.mxu1 %v4094_v33 }
 0xb9c   :  { %3645 = vmatmul.mubr.msk.f32.vlgmr.msra.gmra.mrb[12].mxu1 %vm1499_vm15, %v4283_v54 }
 0xb9d   :  { %3872 = vmatpush3.bf16.msra.mxu1 %v3871_v55  ;;  %3655 = vmatprep.mubr.msk.f32.mxu1 %vm4093_vm7, %v4092_v13  ;;  %v3334_v55 = vld [vmem:[#allocation2 + $0x1c8] ss:$0 sm:$0xff] }
 0xb9e   :  { %3873 = vmatprep.subr.bf16.mxu1 %v4094_v33 }
 0xba1   :  { %3875 = vmatpush3.bf16.msra.mxu1 %v3874_v35 }
 0xba2   :  { %3877 = vmatprep.subr.bf16.mxu1 %v3876_v60 }
 0xc6f   :  { %v1569_v4 = vpop.f32.mrb[12].mxu1 }
 0xc70   :  { %v3646_v5 = vpop.f32.mrb[13].mxu1  ;;  %3656 = vmatmul.mubr.msk.f32.vlgmr.msra.gmra.mrb[14].mxu1 %vm139_vm6, %v1569_v4  ;;  %v3336_v4 = vld [vmem:[#allocation2 + $0x1f8] ss:$0 sm:$0xff] }
 0xc71   :  { %3879 = vmatpush3.bf16.msra.mxu1 %v3876_v60  ;;  %3666 = vmatprep.mubr.msk.f32.mxu1 %vm51_vm3, %v3329_v2  ;;  %v3906_v2 = vpack.c.bf16 %v1979_v63, %v1978_v61  ;;  %v3339_v5 = vld [vmem:[#allocation2 + $0x220] ss:$0 sm:$0xff] }
 0xc72   :  { %3882 = vmatprep.subr.msk.bf16.mxu1 %vm4135_vm2, %v3880_v1 }
 0xc75   :  { %3885 = vmatpush3.bf16.msk.msra.mxu1 %vm4135_vm2, %v3880_v1 }
 0xc76   :  { %3895 = vmatprep.subr.bf16.mxu1 %v3894_v39 }
 0xc78   :  { %3667 = vmatmul.mubr.msk.f32.vlgmr.msra.gmra.mrb[16].mxu1 %vm51_vm3, %v3330_v62 }
 0xc79   :  { %3897 = vmatpush3.bf16.msra.mxu1 %v3894_v39 }
 0xc7a   :  { %3899 = vmatprep.subr.bf16.mxu1 %v3898_v45 }
 0xc7d   :  { %3901 = vmatpush3.bf16.msra.mxu1 %v3898_v45 }
 0xc7e   :  { %3702 = vmatprep.subr.mxu1 %v4092_v13 }
 0xd43   :  { %v4302_v6 = vpop.f32.mrb[14].mxu1 }
 0xd44   :  { %v3657_v7 = vpop.f32.mrb[15].mxu1 }
 0xd4b   :  { %v3668_v15 = vpop.f32.mrb[16].mxu1 }
 0xd4c   :  { %v1759_v16 = vadd.f32 %v3668_v15, %v1677_v12  ;;  %v1753_v17 = vpop.f32.mrb[17].mxu1 }
 0xd4d   :  { %v1754_v18 = vadd.f32 %v1753_v17, %v1676_v14 }
 0xd4e   :  { %v1767_v19 = vsel %vm139_vm6, %v1759_v16, 0.0 }
 0xd4f   :  { %1768 = vadd.xlane.f32.xlu0 %v1767_v19  ;;  %v1764_v11 = vsel %vm139_vm6, %v1754_v18, 0.0 }
 0xd50   :  { %1765 = vadd.xlane.f32.xlu1 %v1764_v11  ;;  %v3342_v11 = vld [vmem:[#allocation2 + $0x248] ss:$0 sm:$0xff] }
 0xddc   :  { %v1769_v9 = vpop.xlane.xlu0 %1768 }
 0xddd   :  { %v1771_v20 = vmul.f32 0.03125, %v1769_v9  ;;  %v1766_v21 = vpop.xlane.xlu1 %1765 }
 0xdde   :  { %v1770_v23 = vmul.f32 0.03125, %v1766_v21 }
 0xddf   :  { %v1773_v24 = vsub.f32 %v1759_v16, %v1771_v20 }
 0xde0   :  { %v1772_v25 = vsub.f32 %v1754_v18, %v1770_v23 }
 0xde1   :  { %v1775_v26 = vmul.f32 %v1773_v24, %v1773_v24 }
 0xde2   :  { %v1774_v28 = vmul.f32 %v1772_v25, %v1772_v25 }
 0xde3   :  { %v1779_v30 = vsel %vm139_vm6, %v1775_v26, 0.0 }
 0xde4   :  { %1780 = vadd.xlane.f32.xlu0 %v1779_v30  ;;  %v1776_v31 = vsel %vm139_vm6, %v1774_v28, 0.0  ;;  %v3346_v30 = vld [vmem:[%s4434_s1 + $0x3] sm:$0x1] }
 0xde5   :  { %1777 = vadd.xlane.f32.xlu1 %v1776_v31  ;;  %v3345_v31 = vld [vmem:[%s4434_s1 + $0x2] sm:$0x1]  ;;  %v2064_v32 = vsub.f32 1.0, %v3346_v30  ;;  %s4095_s1 = smov 32  }
 0xde6   :  { %v2063_v34 = vsub.f32 1.0, %v3345_v31 }
 0xde7   :  { %v2066_v38 = vmul.f32 -1e+09, %v2064_v32 }
 0xde8   :  { %v2065_v40 = vmul.f32 -1e+09, %v2063_v34 }
 0xde9   :  { %v2232_v46 = vrot.slane %v2066_v38, %v4231_v42  ;;  %v2731_v38 = vld [vmem:[#allocation2 + $0x260] sm:$0xff] }
 0xe71   :  { %v1781_v48 = vpop.xlane.xlu0 %1780 }
 0xe72   :  { %v1783_v49 = vmul.f32 0.03125, %v1781_v48  ;;  %v1778_v50 = vpop.xlane.xlu1 %1777 }
 0xe73   :  { %v1782_v10 = vmul.f32 0.03125, %v1778_v50 }
 0xe74   :  { %v1785_v51 = vadd.f32 1e-12, %v1783_v49  ;;  %v2228_v49 = vrot.slane %v2065_v40, %v4231_v42 }
 0xe75   :  { %v1784_v52 = vadd.f32 1e-12, %v1782_v10 }
 0xe76   :  { %4003 = vrsqrt.f32 %v1785_v51 }
 0xe77   :  { %4005 = vrsqrt.f32 %v1784_v52 }
 0xe80   :  { %v4004_v53 = vpop.eup %4003 }
 0xe81   :  { %v4006_v56 = vpop.eup %4005  ;;  %v1789_v57 = vmul.f32 %v4004_v53, %v1773_v24 }
 0xe82   :  { %v1788_v35 = vmul.f32 %v4006_v56, %v1772_v25 }
 0xe83   :  { %v1795_v59 = vmul.f32 %v3334_v55, %v1789_v57 }
 0xe84   :  { %v1794_v60 = vmul.f32 %v3334_v55, %v1788_v35 }
 0xe85   :  { %v4311_v1 = vadd.f32 %v3335_v58, %v1795_v59 }
 0xe86   :  { %v4309_v0 = vadd.f32 %v3335_v58, %v1794_v60 }
 0xe88   :  { %3677 = vmatprep.mubr.msk.f32.mxu0 %vm139_vm6, %v4309_v0  ;;  %3688 = vmatprep.mubr.msk.f32.mxu1 %vm139_vm6, %v4309_v0 }
 0xe89   :  { %3678 = vmatmul.mubr.msk.f32.vlgmr.msra.gmra.mrb[14].mxu0 %vm139_vm6, %v4311_v1  ;;  %3689 = vmatmul.mubr.msk.f32.vlgmr.msra.gmra.mrb[18].mxu1 %vm139_vm6, %v4311_v1 }
 0xe8a   :  { %3905 = vmatpush3.bf16.msra.mxu0 %v3902_v27  ;;  %3699 = vmatprep.mubr.msk.f32.mxu0 %vm139_vm6, %v4309_v0 }
 0xe8b   :  { %3907 = vmatprep.subr.bf16.mxu0 %v3906_v2  ;;  %3704 = vmatprep.mubr.msk.f32.mxu1 %vm4093_vm7, %v4092_v13 }
 0xe8e   :  { %3909 = vmatpush3.bf16.msra.mxu0 %v3906_v2 }
 0xe8f   :  { %3707 = vmatprep.subr.mxu0 %v4092_v13 }
 0xe91   :  { %3700 = vmatmul.mubr.msk.f32.vlgmr.msra.gmra.mrb[16].mxu0 %vm139_vm6, %v4311_v1 }
 0xe92   :  { %3709 = vmatprep.mubr.msk.f32.mxu0 %vm4093_vm7, %v4092_v13 }
 0xf5c   :  { %v3679_v3 = vpop.f32.mrb[14].mxu0  ;;  %v3690_v62 = vpop.f32.mrb[18].mxu1 }
 0xf5d   :  { %v1889_v7 = vadd.f32 %v3679_v3, %v3336_v4  ;;  %v1973_v12 = vadd.f32 %v3690_v62, %v3339_v5  ;;  %v1883_v14 = vpop.f32.mrb[15].mxu0  ;;  %v1967_v15 = vpop.f32.mrb[19].mxu1 }
 0xf5e   :  { %v1884_v16 = vadd.f32 %v3336_v4, %v1883_v14  ;;  %v1968_v17 = vadd.f32 %v3339_v5, %v1967_v15 }
 0xf5f   :  { %v2068_v18 = vmul.f32 %v4182_v8, %v1889_v7  ;;  %3708 = vmatpush3.xpose.msk.msra.mxu0 %vm139_vm6, %v1973_v12  ;;  %v2262_v9 = vmul.f32 %v4190_v22, %v1889_v7 }
 0xf60   :  { %v2067_v19 = vmul.f32 %v4182_v8, %v1884_v16  ;;  %3703 = vmatpush3.xpose.msk.msra.mxu1 %vm139_vm6, %v1968_v17  ;;  %3717 = vmatprep.subr.mxu0 %v4092_v13  ;;  %v2261_v21 = vmul.f32 %v4190_v22, %v1884_v16 }
 0xf61   :  { %3712 = vmatprep.subr.mxu1 %v4092_v13 }
 0xf62   :  { %3710 = vmatmul.mubr.msk.f32.vlgmr.msra.gmra.mrb[18].mxu0 %vm139_vm6, %v2068_v18 }
 0xf63   :  { %3705 = vmatmul.mubr.msk.f32.vlgmr.msra.gmra.mrb[20].mxu1 %vm139_vm6, %v2067_v19  ;;  %3718 = vmatpush3.xpose.msk.msra.mxu0 %vm139_vm6, %v1973_v12 }
 0xf64   :  { %v3701_v20 = vpop.f32.mrb[16].mxu0  ;;  %3713 = vmatpush3.xpose.msk.msra.mxu1 %vm139_vm6, %v1968_v17  ;;  %3719 = vmatprep.mubr.msk.f32.mxu0 %vm4093_vm7, %v4092_v13 }
 0xf65   :  { %v4344_v23 = vadd.f32 %v3701_v20, %v3342_v11  ;;  %v2051_v24 = vpop.f32.mrb[17].mxu0  ;;  %3714 = vmatprep.mubr.msk.f32.mxu1 %vm4093_vm7, %v4092_v13  ;;  %3727 = vmatprep.subr.mxu0 %v4092_v13 }
 0xf66   :  { %v4349_v25 = vadd.f32 %v3342_v11, %v2051_v24  ;;  %3720 = vmatmul.mubr.msk.f32.vlgmr.msra.gmra.mrb[20].mxu0 %vm139_vm6, %v2262_v9  ;;  %3722 = vmatprep.subr.mxu1 %v4092_v13  ;;  %v2729_v24 = vld [vmem:[#allocation2 + $0x250] sm:$0xff] }
 0xf67   :  { %v2436_v26 = vmul.f32 %v4190_v22, %v4344_v23  ;;  %3715 = vmatmul.mubr.msk.f32.vlgmr.msra.gmra.mrb[22].mxu1 %vm139_vm6, %v2261_v21  ;;  %3729 = vmatprep.mubr.msk.f32.mxu0 %vm4093_vm7, %v4092_v13  ;;  %v2260_v32 = vmul.f32 %v4182_v8, %v4344_v23 }
 0xf68   :  { %v2435_v28 = vmul.f32 %v4190_v22, %v4349_v25  ;;  %3724 = vmatprep.mubr.msk.f32.mxu1 %vm4093_vm7, %v4092_v13 }
 0xf69   :  { %3728 = vmatpush3.msra.mxu0 %v2436_v26  ;;  %v2730_v26 = vld [vmem:[#allocation2 + $0x258] sm:$0xff] }
 0xf6a   :  { %3723 = vmatpush3.msra.mxu1 %v2435_v28  ;;  %3737 = vmatprep.subr.mxu0 %v4092_v13 }
 0xf6b   :  { %3732 = vmatprep.subr.mxu1 %v4092_v13 }
0x1035   :  { %v2217_v22 = vpop.f32.mrb[18].mxu0 }
0x1036   :  { %v2141_v36 = vpop.f32.mrb[20].mxu1  ;;  %v3711_v37 = vpop.f32.mrb[19].mxu0  ;;  %v2222_v29 = vmul.f32 0.25, %v2217_v22  ;;  %v3910_v22 = vpack.c.bf16 %v2730_v26, %v2729_v24  ;;  %v2969_v26 = vld [vmem:[#allocation2 + $0x2b0] sm:$0xff] }
0x1037   :  { %v3706_v39 = vpop.f32.mrb[21].mxu1  ;;  %v2221_v47 = vmul.f32 0.25, %v2141_v36  ;;  %v2259_v36 = vmul.f32 %v4182_v8, %v4349_v25 }
0x1038   :  { %v2236_v52 = vadd.f32 %v2232_v46, %v2222_v29  ;;  %v2732_v39 = vld [vmem:[#allocation2 + $0x268] sm:$0xff] }
0x1039   :  { %v2405_v41 = vpop.f32.mrb[20].mxu0  ;;  %v2235_v55 = vadd.f32 %v2228_v49, %v2221_v47  ;;  %v3914_v8 = vpack.c.bf16 %v2732_v39, %v2731_v38  ;;  %v2976_v38 = vld [vmem:[#allocation2 + $0x2e8] sm:$0xff] }
0x103a   :  { %v2410_v43 = vmul.f32 0.25, %v2405_v41  ;;  %v2332_v44 = vpop.f32.mrb[22].mxu1  ;;  %v3721_v45 = vpop.f32.mrb[21].mxu0  ;;  %v2240_v56 = vsel %vm618_vm12, %v2236_v52, -inf }
0x103b   :  { %v2409_v27 = vmul.f32 0.25, %v2332_v44  ;;  %v3716_v48 = vpop.f32.mrb[23].mxu1  ;;  %v2237_v57 = vsel %vm618_vm12, %v2235_v55, -inf  ;;  %v3359_v45 = vld [vmem:[#allocation2 + $0x270] ss:$0 sm:$0xff] }
0x103c   :  { %v2412_v50 = vadd.f32 %v2410_v43, %v2232_v46 }
0x103d   :  { %v2411_v10 = vadd.f32 %v2409_v27, %v2228_v49 }
0x103e   :  { %v2416_v51 = vsel %vm618_vm12, %v2412_v50, -inf }
0x103f   :  { %2417 = vmax.xlane.f32.xlu0 %v2416_v51  ;;  %v2413_v53 = vsel %vm618_vm12, %v2411_v10, -inf }
0x1040   :  { %2414 = vmax.xlane.f32.xlu1 %v2413_v53 }
0x1043   :  { %2241 = vmax.xlane.f32.xlu0 %v2240_v56 }
0x1044   :  { %2238 = vmax.xlane.f32.xlu1 %v2237_v57 }
0x10cc   :  { %v2418_v35 = vpop.xlane.xlu0 %2417 }
0x10cd   :  { %v2420_v58 = vsub.f32 %v2412_v50, %v2418_v35  ;;  %v2415_v59 = vpop.xlane.xlu1 %2414 }
0x10ce   :  { %v2419_v42 = vsub.f32 %v2411_v10, %v2415_v59 }
0x10cf   :  { %v2423_v60 = vmul.f32 1.442695, %v2420_v58 }
0x10d0   :  { %v2421_v61 = vmul.f32 1.442695, %v2419_v42  ;;  %v2242_v63 = vpop.xlane.xlu0 %2241 }
0x10d1   :  { %4007 = vpow2.f32 %v2423_v60  ;;  %v2244_v2 = vsub.f32 %v2236_v52, %v2242_v63  ;;  %v2239_v4 = vpop.xlane.xlu1 %2238  ;;  %v2862_v60 = vld [vmem:[#allocation2 + $0x290] sm:$0xff]  ;;  %v2863_v63 = vld [vmem:[#allocation2 + $0x298] sm:$0xff] }
0x10d2   :  { %4009 = vpow2.f32 %v2421_v61  ;;  %v2243_v5 = vsub.f32 %v2235_v55, %v2239_v4 }
0x10d3   :  { %v2247_v3 = vmul.f32 1.442695, %v2244_v2  ;;  %v2864_v2 = vld [vmem:[#allocation2 + $0x2a0] sm:$0xff] }
0x10d4   :  { %v2245_v62 = vmul.f32 1.442695, %v2243_v5  ;;  %v3922_v4 = vpack.c.bf16 %v2864_v2, %v2863_v63 }
0x10d5   :  { %4011 = vpow2.f32 %v2247_v3 }
0x10d6   :  { %4013 = vpow2.f32 %v2245_v62 }
0x10db   :  { %v4008_v7 = vpop.eup %4007 }
0x10dc   :  { %v4010_v12 = vpop.eup %4009  ;;  %v2428_v14 = vsel %vm618_vm12, %v4008_v7, 0.0 }
0x10dd   :  { %2429 = vadd.xlane.f32.xlu0 %v2428_v14  ;;  %v2425_v15 = vsel %vm618_vm12, %v4010_v12, 0.0 }
0x10de   :  { %2426 = vadd.xlane.f32.xlu1 %v2425_v15 }
0x10df   :  { %v4012_v16 = vpop.eup %4011 }
0x10e0   :  { %v4014_v17 = vpop.eup %4013  ;;  %v2252_v18 = vsel %vm618_vm12, %v4012_v16, 0.0 }
0x10e1   :  { %2253 = vadd.xlane.f32.xlu0 %v2252_v18  ;;  %v2249_v19 = vsel %vm618_vm12, %v4014_v17, 0.0 }
0x10e2   :  { %2250 = vadd.xlane.f32.xlu1 %v2249_v19 }
0x116a   :  { %v2430_v11 = vpop.xlane.xlu0 %2429 }
0x116b   :  { %4015 = vrcp.f32 %v2430_v11  ;;  %v2427_v9 = vpop.xlane.xlu1 %2426  ;;  %v3363_v11 = vld [vmem:[#allocation2 + $0x280] ss:$0 sm:$0xff] }
0x116c   :  { %4017 = vrcp.f32 %v2427_v9 }
0x116e   :  { %v2254_v20 = vpop.xlane.xlu0 %2253 }
0x116f   :  { %v2251_v21 = vpop.xlane.xlu1 %2250  ;;  %4019 = vrcp.f32 %v2254_v20 }
0x1170   :  { %4021 = vrcp.f32 %v2251_v21 }
0x1175   :  { %v4016_v28 = vpop.eup %4015 }
0x1176   :  { %v4018_v30 = vpop.eup %4017  ;;  %v2434_v31 = vmul.f32 %v4016_v28, %v4008_v7  ;;  %v2970_v28 = vld [vmem:[#allocation2 + $0x2b8] sm:$0xff] }
0x1177   :  { %v2433_v34 = vmul.f32 %v4018_v30, %v4010_v12  ;;  %v3926_v30 = vpack.c.bf16 %v2970_v28, %v2969_v26  ;;  %v3370_v28 = vld [vmem:[#allocation2 + $0x2f8] ss:$0 sm:$0xff] }
0x1178   :  { %3730 = vmatmul.mubr.msk.f32.vlgmr.msra.gmra.mrb[22].mxu0 %vm618_vm12, %v2434_v31  ;;  %v2971_v31 = vld [vmem:[#allocation2 + $0x2c0] sm:$0xff] }
0x1179   :  { %3738 = vmatpush3.msra.mxu0 %v2260_v32  ;;  %3725 = vmatmul.mubr.msk.f32.vlgmr.msra.gmra.mrb[24].mxu1 %vm618_vm12, %v2433_v34  ;;  %v4020_v37 = vpop.eup %4019  ;;  %v2972_v32 = vld [vmem:[#allocation2 + $0x2c8] sm:$0xff] }
0x117a   :  { %3733 = vmatpush3.msra.mxu1 %v2259_v36  ;;  %3739 = vmatprep.mubr.msk.f32.mxu0 %vm4093_vm7, %v4092_v13  ;;  %v4022_v23 = vpop.eup %4021  ;;  %v2258_v40 = vmul.f32 %v4020_v37, %v4012_v16  ;;  %v3362_v16 = vld [vmem:[#allocation2 + $0x278] ss:$0 sm:$0xff]  ;;  %v3930_v34 = vpack.c.bf16 %v2972_v32, %v2971_v31 }
0x117b   :  { %3734 = vmatprep.mubr.msk.f32.mxu1 %vm4093_vm7, %v4092_v13  ;;  %3911 = vmatprep.subr.bf16.mxu1 %v3910_v22  ;;  %v2257_v41 = vmul.f32 %v4022_v23, %v4014_v17  ;;  %v2974_v36 = vld [vmem:[#allocation2 + $0x2d8] sm:$0xff]  ;;  %v2975_v23 = vld [vmem:[#allocation2 + $0x2e0] sm:$0xff] }
0x117c   :  { %v3938_v39 = vpack.c.bf16 %v2976_v38, %v2975_v23  ;;  %v3175_v38 = vld [vmem:[#allocation2 + $0x308] sm:$0xff] }
0x1180   :  { %3740 = vmatmul.mubr.msk.f32.vlgmr.msra.gmra.mrb[22].mxu0 %vm618_vm12, %v2258_v40  ;;  %v3364_v40 = vld [vmem:[#allocation2 + $0x2a8] ss:$0 sm:$0xff] }
0x1181   :  { %3735 = vmatmul.mubr.msk.f32.vlgmr.msra.gmra.mrb[24].mxu1 %vm618_vm12, %v2257_v41 }
0x1182   :  { %3913 = vmatpush3.bf16.msra.mxu1 %v3910_v22  ;;  %v2973_v22 = vld [vmem:[#allocation2 + $0x2d0] sm:$0xff] }
0x1183   :  { %3915 = vmatprep.subr.bf16.mxu1 %v3914_v8  ;;  %v3934_v37 = vpack.c.bf16 %v2974_v36, %v2973_v22 }
0x1186   :  { %3917 = vmatpush3.bf16.msra.mxu1 %v3914_v8 }
0x1187   :  { %3927 = vmatprep.subr.bf16.mxu1 %v3926_v30 }
0x1253   :  { %v2725_v25 = vpop.f32.mrb[22].mxu0 }
0x1254   :  { %v2652_v29 = vpop.f32.mrb[24].mxu1  ;;  %v3741_v43 = vpop.f32.mrb[23].mxu0 }
0x1255   :  { %v3736_v44 = vpop.f32.mrb[25].mxu1  ;;  %3750 = vmatprep.mubr.msk.f32.mxu1 %vm139_vm6, %v2652_v29 }
0x1256   :  { %3751 = vmatmul.mubr.msk.f32.vlgmr.msra.gmra.mrb[26].mxu1 %vm139_vm6, %v2725_v25 }
0x1257   :  { %3929 = vmatpush3.bf16.msra.mxu1 %v3926_v30 }
0x1258   :  { %3931 = vmatprep.subr.bf16.mxu1 %v3930_v34 }
0x125b   :  { %3933 = vmatpush3.bf16.msra.mxu1 %v3930_v34  ;;  %v3371_v34 = vld [vmem:[#allocation2 + $0x300] ss:$0 sm:$0xff] }
0x125c   :  { %3935 = vmatprep.subr.bf16.mxu1 %v3934_v37 }
0x125f   :  { %3937 = vmatpush3.bf16.msra.mxu1 %v3934_v37 }
0x1260   :  { %3939 = vmatprep.subr.bf16.mxu1 %v3938_v39 }
0x1263   :  { %3941 = vmatpush3.bf16.msra.mxu1 %v3938_v39  ;;  %v3176_v39 = vld [vmem:[#allocation2 + $0x310] sm:$0xff] }
0x1329   :  { %v3752_v46 = vpop.f32.mrb[26].mxu1 }
0x132a   :  { %v2816_v47 = vadd.f32 %v3752_v46, %v3359_v45  ;;  %v2810_v27 = vpop.f32.mrb[27].mxu1 }
0x132b   :  { %v2811_v48 = vadd.f32 %v3359_v45, %v2810_v27 }
0x132c   :  { %v2820_v49 = vadd.f32 %v2816_v47, %v4311_v1 }
0x132d   :  { %v2819_v50 = vadd.f32 %v2811_v48, %v4309_v0  ;;  %v2861_v0 = vld [vmem:[#allocation2 + $0x288] sm:$0xff] }
0x132e   :  { %v2826_v10 = vsel %vm139_vm6, %v2820_v49, 0.0  ;;  %v3918_v61 = vpack.c.bf16 %v2862_v60, %v2861_v0 }
0x132f   :  { %2827 = vadd.xlane.f32.xlu0 %v2826_v10  ;;  %v2823_v51 = vsel %vm139_vm6, %v2819_v50, 0.0 }
0x1330   :  { %2824 = vadd.xlane.f32.xlu1 %v2823_v51  ;;  %3919 = vmatprep.subr.bf16.mxu0 %v3918_v61 }
0x1331   :  { %3921 = vmatpush3.bf16.msra.mxu0 %v3918_v61 }
0x1332   :  { %3923 = vmatprep.subr.bf16.mxu0 %v3922_v4 }
0x1335   :  { %3925 = vmatpush3.bf16.msra.mxu0 %v3922_v4 }
0x1336   :  { %3942 = vmatprep.subr.bf16.mxu0 %v4094_v33 }
0x13bc   :  { %v2828_v52 = vpop.xlane.xlu0 %2827 }
0x13bd   :  { %v2830_v53 = vmul.f32 0.03125, %v2828_v52  ;;  %v2825_v55 = vpop.xlane.xlu1 %2824 }
0x13be   :  { %v2829_v56 = vmul.f32 0.03125, %v2825_v55 }
0x13bf   :  { %v2832_v57 = vsub.f32 %v2820_v49, %v2830_v53 }
0x13c0   :  { %v2831_v35 = vsub.f32 %v2819_v50, %v2829_v56 }
0x13c1   :  { %v2834_v58 = vmul.f32 %v2832_v57, %v2832_v57 }
0x13c2   :  { %v2833_v59 = vmul.f32 %v2831_v35, %v2831_v35 }
0x13c3   :  { %v2838_v42 = vsel %vm139_vm6, %v2834_v58, 0.0 }
0x13c4   :  { %2839 = vadd.xlane.f32.xlu0 %v2838_v42  ;;  %v2835_v1 = vsel %vm139_vm6, %v2833_v59, 0.0  ;;  %v3367_v59 = vld [vmem:[#allocation2 + $0x2f0] ss:$0 sm:$0xff] }
0x13c5   :  { %2836 = vadd.xlane.f32.xlu1 %v2835_v1 }
0x1451   :  { %v2840_v5 = vpop.xlane.xlu0 %2839 }
0x1452   :  { %v2842_v3 = vmul.f32 0.03125, %v2840_v5  ;;  %v2837_v62 = vpop.xlane.xlu1 %2836 }
0x1453   :  { %v2841_v7 = vmul.f32 0.03125, %v2837_v62 }
0x1454   :  { %v2844_v12 = vadd.f32 1e-12, %v2842_v3 }
0x1455   :  { %v2843_v14 = vadd.f32 1e-12, %v2841_v7 }
0x1456   :  { %4023 = vrsqrt.f32 %v2844_v12 }
0x1457   :  { %4025 = vrsqrt.f32 %v2843_v14 }
0x1460   :  { %v4024_v15 = vpop.eup %4023 }
0x1461   :  { %v4026_v17 = vpop.eup %4025  ;;  %v2848_v18 = vmul.f32 %v4024_v15, %v2832_v57 }
0x1462   :  { %v2847_v19 = vmul.f32 %v4026_v17, %v2831_v35 }
0x1463   :  { %v2854_v9 = vmul.f32 %v3362_v16, %v2848_v18 }
0x1464   :  { %v2853_v20 = vmul.f32 %v3362_v16, %v2847_v19 }
0x1465   :  { %v2860_v24 = vadd.f32 %v3363_v11, %v2854_v9 }
0x1466   :  { %v2859_v21 = vadd.f32 %v3363_v11, %v2853_v20 }
0x1468   :  { %3761 = vmatprep.mubr.msk.f32.mxu0 %vm139_vm6, %v2859_v21 }
0x1469   :  { %3762 = vmatmul.mubr.msk.f32.vlgmr.msra.gmra.mrb[24].mxu0 %vm139_vm6, %v2860_v24 }
0x146a   :  { %3787 = vmatprep.mubr.msk.f32.mxu0 %vm4093_vm7, %v4092_v13 }
0x153c   :  { %v3763_v41 = vpop.f32.mrb[24].mxu0 }
0x153d   :  { %v2948_v8 = vadd.f32 %v3763_v41, %v3364_v40  ;;  %v2942_v25 = vpop.f32.mrb[25].mxu0  ;;  %v3946_v41 = vpack.c.bf16 %v3176_v39, %v3175_v38 }
0x153e   :  { %v2943_v29 = vadd.f32 %v3364_v40, %v2942_v25  ;;  %v3178_v25 = vld [vmem:[#allocation2 + $0x320] sm:$0xff] }
0x153f   :  { %v2952_v43 = vmul.f32 %v2948_v8, %v2948_v8 }
0x1540   :  { %v2951_v44 = vmul.f32 %v2943_v29, %v2943_v29 }
0x1541   :  { %v2954_v45 = vmul.f32 %v2952_v43, %v2948_v8 }
0x1542   :  { %v2953_v46 = vmul.f32 %v2951_v44, %v2943_v29 }
0x1543   :  { %v2956_v47 = vmul.f32 0.044715, %v2954_v45  ;;  %v3373_v45 = vld [vmem:[#allocation2 + $0x328] ss:$0 sm:$0xff] }
0x1544   :  { %v2955_v27 = vmul.f32 0.044715, %v2953_v46 }
0x1545   :  { %v2958_v48 = vadd.f32 %v2956_v47, %v2948_v8 }
0x1546   :  { %v2957_v49 = vadd.f32 %v2955_v27, %v2943_v29 }
0x1547   :  { %v2960_v50 = vmul.f32 0.7978846, %v2958_v48 }
0x1548   :  { %v2959_v10 = vmul.f32 0.7978846, %v2957_v49 }
0x1549   :  { %4027 = vtanh.f32 %v2960_v50 }
0x154a   :  { %4029 = vtanh.f32 %v2959_v10 }
0x1553   :  { %v4028_v51 = vpop.eup %4027 }
0x1554   :  { %v4030_v52 = vpop.eup %4029  ;;  %v2964_v53 = vadd.f32 1.0, %v4028_v51 }
0x1555   :  { %v2963_v55 = vadd.f32 1.0, %v4030_v52 }
0x1556   :  { %v2966_v56 = vmul.f32 0.5, %v2964_v53 }
0x1557   :  { %v2965_v57 = vmul.f32 0.5, %v2963_v55 }
0x1558   :  { %v2968_v58 = vmul.f32 %v2966_v56, %v2948_v8  ;;  %v3177_v8 = vld [vmem:[#allocation2 + $0x318] sm:$0xff] }
0x1559   :  { %v2967_v35 = vmul.f32 %v2965_v57, %v2943_v29  ;;  %v3949_v29 = vpack.c.bf16 %v3178_v25, %v3177_v8 }
0x155b   :  { %3780 = vmatprep.mubr.msk.f32.mxu1 %vm1369_vm13, %v2967_v35 }
0x155c   :  { %3781 = vmatmul.mubr.msk.f32.vlgmr.msra.gmra.mrb[28].mxu1 %vm1369_vm13, %v2968_v58 }
0x162f   :  { %v3782_v42 = vpop.f32.mrb[28].mxu1 }
0x1630   :  { %v3060_v1 = vadd.f32 %v3782_v42, %v3367_v59  ;;  %v3054_v0 = vpop.f32.mrb[29].mxu1 }
0x1631   :  { %v3055_v60 = vadd.f32 %v3367_v59, %v3054_v0 }
0x1632   :  { %v3064_v61 = vadd.f32 %v3060_v1, %v2860_v24 }
0x1633   :  { %v3063_v63 = vadd.f32 %v3055_v60, %v2859_v21 }
0x1634   :  { %v3070_v2 = vsel %vm139_vm6, %v3064_v61, 0.0 }
0x1635   :  { %3071 = vadd.xlane.f32.xlu0 %v3070_v2  ;;  %v3067_v4 = vsel %vm139_vm6, %v3063_v63, 0.0 }
0x1636   :  { %3068 = vadd.xlane.f32.xlu1 %v3067_v4 }
0x16c2   :  { %v3072_v5 = vpop.xlane.xlu0 %3071 }
0x16c3   :  { %v3074_v3 = vmul.f32 0.03125, %v3072_v5  ;;  %v3069_v62 = vpop.xlane.xlu1 %3068 }
0x16c4   :  { %v3073_v7 = vmul.f32 0.03125, %v3069_v62 }
0x16c5   :  { %v3076_v12 = vsub.f32 %v3064_v61, %v3074_v3 }
0x16c6   :  { %v3075_v14 = vsub.f32 %v3063_v63, %v3073_v7 }
0x16c7   :  { %v3078_v15 = vmul.f32 %v3076_v12, %v3076_v12 }
0x16c8   :  { %v3077_v16 = vmul.f32 %v3075_v14, %v3075_v14 }
0x16c9   :  { %v3082_v17 = vsel %vm139_vm6, %v3078_v15, 0.0 }
0x16ca   :  { %3083 = vadd.xlane.f32.xlu0 %v3082_v17  ;;  %v3079_v18 = vsel %vm139_vm6, %v3077_v16, 0.0 }
0x16cb   :  { %3080 = vadd.xlane.f32.xlu1 %v3079_v18 }
0x1757   :  { %v3084_v19 = vpop.xlane.xlu0 %3083 }
0x1758   :  { %v3086_v11 = vmul.f32 0.03125, %v3084_v19  ;;  %v3081_v9 = vpop.xlane.xlu1 %3080 }
0x1759   :  { %v3085_v20 = vmul.f32 0.03125, %v3081_v9 }
0x175a   :  { %v3088_v21 = vadd.f32 1e-12, %v3086_v11 }
0x175b   :  { %v3087_v24 = vadd.f32 1e-12, %v3085_v20 }
0x175c   :  { %4031 = vrsqrt.f32 %v3088_v21 }
0x175d   :  { %4033 = vrsqrt.f32 %v3087_v24 }
0x1766   :  { %v4032_v26 = vpop.eup %4031 }
0x1767   :  { %v4034_v30 = vpop.eup %4033  ;;  %v3092_v31 = vmul.f32 %v4032_v26, %v3076_v12 }
0x1768   :  { %v3091_v32 = vmul.f32 %v4034_v30, %v3075_v14 }
0x1769   :  { %v3098_v22 = vmul.f32 %v3370_v28, %v3092_v31 }
0x176a   :  { %v3097_v36 = vmul.f32 %v3370_v28, %v3091_v32 }
0x176b   :  { %v3104_v37 = vadd.f32 %v3371_v34, %v3098_v22 }
0x176c   :  { %v3103_v23 = vadd.f32 %v3371_v34, %v3097_v36 }
0x176e   :  { %v3943_v40 = vpack.c.bf16 %v3104_v37, %v3103_v23 }
0x1770   :  { %3944 = vmatpush3.bf16.msra.mxu0 %v3943_v40 }
0x1771   :  { %3945 = vmatprep.subr.bf16.mxu0 %v4094_v33 }
0x1773   :  { %3788 = vmatmul.mubr.msk.f32.vlgmr.msra.gmra.mrb[26].mxu0 %vm1499_vm15, %v4283_v54  ;;  %v3325_v54 = vld [vmem:[#allocation2 + $0x190] ss:$0 sm:$0xff] }
0x1774   :  { %3947 = vmatpush3.bf16.msra.mxu0 %v3946_v41  ;;  %3798 = vmatprep.mubr.msk.f32.mxu0 %vm4093_vm7, %v4092_v13  ;;  %v1652_v49 = vadd.f32 %v3325_v54, %v4302_v6 }
0x1775   :  { %3948 = vmatprep.subr.bf16.mxu0 %v4094_v33 }
0x1778   :  { %3950 = vmatpush3.bf16.msra.mxu0 %v3949_v29 }
0x1846   :  { %v3171_v43 = vpop.f32.mrb[26].mxu0 }
0x1847   :  { %v3789_v44 = vpop.f32.mrb[27].mxu0  ;;  %3799 = vmatmul.mubr.msk.f32.vlgmr.msra.gmra.mrb[28].mxu0 %vm139_vm6, %v3171_v43 }
0x191a   :  { %v3253_v46 = vpop.f32.mrb[28].mxu0 }
0x191b   :  { %v3254_v47 = vadd.f32 %v3373_v45, %v3253_v46  ;;  %v3800_v27 = vpop.f32.mrb[29].mxu0 }
0x191d   :  { %4035 = vtanh.f32 %v3254_v47 }
0x191e   :  { %4037 = vtanh.f32 %v1652_v49 }
0x1927   :  { %v4036_v48 = vpop.eup %4035 }
0x1928   :  { %3259 = vrot.lane.b32.xlu1 %v4036_v48, %s4095_s1  ;;  %v4038_v13 = vpop.eup %4037 }
0x199a   :  { %v3260_v33 = vpop.permute.xlu1 %3259 }
0x199b   :  { %v3262_v50 = vsel %vm139_vm6, %v4038_v13, %v3260_v33 }
0x199c   :  { %v3263_v10 = vsel %vm1369_vm13, %v3262_v50, 0.0 }
0x199d   :  { %3264 = vst [vmem:[#allocation5] sm:$0x3] %v3263_v10 }
0x199e   :  { %4072 = shalt.err (!%p4069_p12)
}
0x199f   :  { %s4073_s18 = scalar_lea.hbm %s4436_s3, 32 }
0x19a0   :  { %p4074_p13 = scmp.ne.s32.totalorder %s4436_s3, %s4073_s18  ;;  %p4077_p0 = scmp.lt.u32.totalorder %s4073_s18, %s4436_s3 }
0x19a2   :  { %p4079_p1 = pnand %p4077_p0, %p4074_p13 }
0x19a4   :  { %4082 = shalt.err (!%p4079_p1)
}
0x19a5   :  { %3274 = dma.vmem_to_hbm [thread:$0]  %s3272_s14, 32, %s4436_s3, [#allocation4]  }
0x19a6   :  { %4085 = dma.done.wait [#allocation4], 32  }
0x19a7   :  { %4086 = vsyncadd [#allocation4], 4294967264 }
0x19a8   :  { %3278 = vsyncpa [#allocation3], 1 }
0x19a9   :  { %3279 = vsyncpa [#allocation4], 1 }

</bundles_post_ra>
